<compile_context>
chip_gen: v5e
topology: v5e:2x2
jax: 0.10.0
libtpu: 0.0.40
codegen_flags: <defaults>
</compile_context>

<pallas_src>
import functools

import jax
import jax.numpy as jnp
from jax.experimental import pallas as pl
from jax.experimental.pallas import tpu as pltpu

_EPS = 1e-5


# ------------------------------- tiling config ------------------------------ #
def _round_up(n, m):
    return (n + m - 1) // m * m


@functools.lru_cache(maxsize=None)
def _tile_config():
    """(tm, tn, tk, vmem_limit_bytes) per TPU generation."""
    try:
        kind = jax.devices()[0].device_kind.lower()
    except Exception:  # pragma: no cover
        kind = ""
    if "v5" in kind:   # 128-wide MXU, 1 vst/cycle: large tm, lane-dense 128 tn
        return 512, 128, 256, 96 * 1024 * 1024
    if "v6" in kind:   # 128 MiB VMEM, memory-bound: biggest tiles
        return 512, 256, 512, 96 * 1024 * 1024
    return 256, 256, 512, 48 * 1024 * 1024   # v7x (64 MiB VMEM) / default


def _largest_divisor_leq(n, cap):
    cap = max(1, min(n, cap))
    for d in range(cap, 0, -1):
        if n % d == 0:
            return d
    return 1


# ----------------------------- Pallas kernels ------------------------------- #
def _matmul_bn_kernel(a_ref, w_ref, sc_ref, bi_ref, o_ref, acc_ref, *, relu):
    # Tiled (tm, tk) @ (tk, tn) with K-reduction over grid axis 2; fused BN (+ReLU) epilogue.
    @pl.when(pl.program_id(2) == 0)
    def _():
        acc_ref[...] = jnp.zeros_like(acc_ref)

    acc_ref[...] += jnp.dot(a_ref[...], w_ref[...], preferred_element_type=jnp.float32)

    @pl.when(pl.program_id(2) == pl.num_programs(2) - 1)
    def _():
        out = acc_ref[...] * sc_ref[...] + bi_ref[...]
        if relu:
            out = jnp.maximum(out, 0.0)
        o_ref[...] = out.astype(o_ref.dtype)


def _matmul_bn_add_relu_kernel(a_ref, w_ref, sc_ref, bi_ref, skip_ref, o_ref, acc_ref):
    # Last 1x1 conv + BN + residual add + final ReLU, fully fused.
    @pl.when(pl.program_id(2) == 0)
    def _():
        acc_ref[...] = jnp.zeros_like(acc_ref)

    acc_ref[...] += jnp.dot(a_ref[...], w_ref[...], preferred_element_type=jnp.float32)

    @pl.when(pl.program_id(2) == pl.num_programs(2) - 1)
    def _():
        out = acc_ref[...] * sc_ref[...] + bi_ref[...] + skip_ref[...].astype(jnp.float32)
        o_ref[...] = jnp.maximum(out, 0.0).astype(o_ref.dtype)


def _conv3x3_kernel(ph_ref, w_ref, sc_ref, bi_ref, o_ref, acc_ref, *, s, tr, wo):
    # ph_ref : (1, s*s, Hph, Wph, C)  phase-decomposed padded image (resident per batch elem)
    # w_ref  : (9, C, tco)            3x3 weights as 9 (C, tco) taps
    # o_ref  : (1, tr, wo, tco)       output row block (wo is 8-aligned padded width)
    # acc_ref: (tr*wo, tco) f32       VMEM accumulator
    r = pl.program_id(1)
    row0 = pl.multiple_of(r * tr, tr)
    C = ph_ref.shape[-1]
    for ky in range(3):
        for kx in range(3):
            tap = ph_ref[0, (ky % s) * s + (kx % s),
                         pl.ds(row0 + ky // s, tr),
                         pl.ds(kx // s, wo), :]                       # (tr, wo, C)
            contrib = jnp.dot(tap.reshape(tr * wo, C), w_ref[ky * 3 + kx],
                              preferred_element_type=jnp.float32)
            if ky == 0 and kx == 0:
                acc_ref[...] = contrib
            else:
                acc_ref[...] += contrib
    out = jnp.maximum(acc_ref[...] * sc_ref[...] + bi_ref[...], 0.0)
    o_ref[...] = out.reshape(1, tr, wo, -1).astype(o_ref.dtype)


# ------------------------------ Pallas wrappers ------------------------------ #
def matmul_bn(a, w, scale, bias, *, relu, out_dtype, skip=None):
    """[relu](a @ w * scale + bias [+ skip]) as a tiled Pallas TPU matmul.

    a: (M, K) bf16, w: (K, Co) bf16, scale/bias: (Co,) f32, skip: (M, Co) or None.
    K and Co must already be channel-padded to multiples of 128.
    """
    M, K = a.shape
    Kw, Co = w.shape
    assert K == Kw and K % 128 == 0 and Co % 128 == 0
    tm_cfg, tn_cfg, tk_cfg, vmem_limit = _tile_config()

    Mp = _round_up(M, 8)
    tm = min(tm_cfg, Mp)
    Mp = _round_up(Mp, tm)
    tn = tn_cfg if Co % tn_cfg == 0 else 128
    tk = tk_cfg if K % tk_cfg == 0 else 128

    if Mp != M:
        a = jnp.pad(a, ((0, Mp - M), (0, 0)))
        if skip is not None:
            skip = jnp.pad(skip, ((0, Mp - M), (0, 0)))

    in_specs = [
        pl.BlockSpec((tm, tk), lambda i, j, k: (i, k)),
        pl.BlockSpec((tk, tn), lambda i, j, k: (k, j)),
        pl.BlockSpec((1, tn), lambda i, j, k: (0, j)),
        pl.BlockSpec((1, tn), lambda i, j, k: (0, j)),
    ]
    args = [a, w, scale.reshape(1, Co), bias.reshape(1, Co)]
    if skip is None:
        kernel = functools.partial(_matmul_bn_kernel, relu=relu)
    else:
        kernel = _matmul_bn_add_relu_kernel
        in_specs.append(pl.BlockSpec((tm, tn), lambda i, j, k: (i, j)))
        args.append(skip)

    out = pl.pallas_call(
        kernel,
        out_shape=jax.ShapeDtypeStruct((Mp, Co), out_dtype),
        grid_spec=pltpu.PrefetchScalarGridSpec(
            num_scalar_prefetch=0,
            grid=(Mp // tm, Co // tn, K // tk),
            in_specs=in_specs,
            out_specs=pl.BlockSpec((tm, tn), lambda i, j, k: (i, j)),
            scratch_shapes=[pltpu.VMEM((tm, tn), jnp.float32)],
        ),
        compiler_params=pltpu.CompilerParams(
            dimension_semantics=("parallel", "parallel", "arbitrary"),
            vmem_limit_bytes=vmem_limit),
    )(*args)
    return out[:M]


def conv3x3_bn_relu(t, w9, scale, bias, *, stride):
    """3x3 conv (pad=1, stride) + folded BN + ReLU on NHWC, channel-padded bf16 input."""
    N, H, W, C = t.shape
    assert w9.shape[1] == C
    Co = w9.shape[2]
    assert C % 128 == 0 and Co % 128 == 0
    s = stride
    Ho = (H - 1) // s + 1
    Wo = (W - 1) // s + 1
    Wo_pad = _round_up(Wo, 8)            # 8-aligned output width -> clean sublane reshapes
    _, _, _, vmem_limit = _tile_config()

    # Spatial zero-pad + phase decomposition (space-to-depth for the stride): one light XLA
    # pass instead of a 9x-expanded im2col matrix in HBM.  Padded so every tap slice of
    # (tr, Wo_pad) rows/cols is statically in-bounds.
    dmax = 2 // s                                          # max(k // s) over the 3x3 taps
    Hph = max(-(-(H + 2) // s), Ho + dmax)
    Wph = max(-(-(W + 2) // s), Wo_pad + dmax)
    tp = jnp.pad(t, ((0, 0), (1, Hph * s - H - 1), (1, Wph * s - W - 1), (0, 0)))
    phases = tp.reshape(N, Hph, s, Wph, s, C).transpose(0, 2, 4, 1, 3, 5)
    phases = phases.reshape(N, s * s, Hph, Wph, C)         # [b, py*s+px, yy, xx, c]

    tr = _largest_divisor_leq(Ho, max(1, 2048 // Wo_pad))  # rows per matmul tile
    tco = 256 if Co % 256 == 0 else 128

    out = pl.pallas_call(
        functools.partial(_conv3x3_kernel, s=s, tr=tr, wo=Wo_pad),
        out_shape=jax.ShapeDtypeStruct((N, Ho, Wo_pad, Co), jnp.bfloat16),
        grid_spec=pltpu.PrefetchScalarGridSpec(
            num_scalar_prefetch=0,
            grid=(N, Ho // tr, Co // tco),
            in_specs=[
                pl.BlockSpec((1, s * s, Hph, Wph, C), lambda b, r, j: (b, 0, 0, 0, 0)),
                pl.BlockSpec((9, C, tco), lambda b, r, j: (0, 0, j)),
                pl.BlockSpec((1, tco), lambda b, r, j: (0, j)),
                pl.BlockSpec((1, tco), lambda b, r, j: (0, j)),
            ],
            out_specs=pl.BlockSpec((1, tr, Wo_pad, tco), lambda b, r, j: (b, r, 0, j)),
            scratch_shapes=[pltpu.VMEM((tr * Wo_pad, tco), jnp.float32)],
        ),
        compiler_params=pltpu.CompilerParams(
            dimension_semantics=("parallel", "parallel", "parallel"),
            vmem_limit_bytes=vmem_limit),
    )(phases, w9, scale.reshape(1, Co), bias.reshape(1, Co))
    return out[:, :, :Wo, :]


# ------------------------------- glue helpers -------------------------------- #
def _fold_bn(gamma, beta, mean, var):
    scale = gamma / jnp.sqrt(var + _EPS)
    bias = beta - mean * scale
    return scale, bias


def _pad_vec(v, c):
    return jnp.pad(v.astype(jnp.float32), (0, c - v.shape[0]))


def _pad_last(x, c):
    return jnp.pad(x, [(0, 0)] * (x.ndim - 1) + [(0, c - x.shape[-1])])


def _w1x1_to_mat(w, kp, cp):   # (Cout, Cin, 1, 1) -> padded (Kp, Cp) bf16
    m = jnp.transpose(w[:, :, 0, 0], (1, 0))
    return jnp.pad(m, ((0, kp - m.shape[0]), (0, cp - m.shape[1]))).astype(jnp.bfloat16)


def _w3x3_to_mat(w, kp, cp):   # (Cout, Cin, 3, 3) -> padded (9, Kp, Cp) bf16
    m = jnp.transpose(w, (2, 3, 1, 0)).reshape(9, w.shape[1], w.shape[0])
    return jnp.pad(m, ((0, 0), (0, kp - m.shape[1]), (0, cp - m.shape[2]))).astype(jnp.bfloat16)


# -------------------------------- ResnetBlock -------------------------------- #
def init_params(key, in_channels, res_channels, out_channels, downsample):
    ks = jax.random.split(key, 16)

    def conv_w(k, cout, cin, kh, kw):
        fan_in = cin * kh * kw
        return jax.random.normal(k, (cout, cin, kh, kw), jnp.float32) / jnp.sqrt(fan_in)

    def bn_p(k, c):
        k1, k2, k3, k4 = jax.random.split(k, 4)
        return dict(
            gamma=1.0 + 0.2 * jax.random.normal(k1, (c,), jnp.float32),
            beta=0.1 * jax.random.normal(k2, (c,), jnp.float32),
            mean=0.1 * jax.random.normal(k3, (c,), jnp.float32),
            var=0.5 + jax.random.uniform(k4, (c,), jnp.float32),
        )

    p = dict(
        conv1=conv_w(ks[0], res_channels, in_channels, 1, 1),
        bn1=bn_p(ks[1], res_channels),
        conv3=conv_w(ks[2], res_channels, res_channels, 3, 3),
        bn3=bn_p(ks[3], res_channels),
        conv2=conv_w(ks[4], out_channels, res_channels, 1, 1),
        bn2=bn_p(ks[5], out_channels),
    )
    if downsample:
        p["skip_conv"] = conv_w(ks[6], out_channels, in_channels, 1, 1)
        p["skip_bn"] = bn_p(ks[7], out_channels)
    return p


def resnet_block_forward(x_nchw, params, *, stride, downsample):
    x = jnp.transpose(x_nchw, (0, 2, 3, 1)).astype(jnp.float32)   # NHWC
    N, H, W, Cin = x.shape
    Cres = params["conv1"].shape[0]
    Cout = params["conv2"].shape[0]
    Cin_p, Cres_p, Cout_p = (_round_up(c, 128) for c in (Cin, Cres, Cout))

    xp = _pad_last(x, Cin_p).astype(jnp.bfloat16)                 # (N, H, W, Cin_p) bf16

    # conv1x1_1 + BN + ReLU (tiled Pallas matmul, bf16 out)
    s1, b1 = _fold_bn(**params["bn1"])
    t1 = matmul_bn(xp.reshape(N * H * W, Cin_p),
                   _w1x1_to_mat(params["conv1"], Cin_p, Cres_p),
                   _pad_vec(s1, Cres_p), _pad_vec(b1, Cres_p),
                   relu=True, out_dtype=jnp.bfloat16)
    t1 = t1.reshape(N, H, W, Cres_p)

    # conv3x3 (stride, pad=1) + BN + ReLU (phase-decomposed Pallas conv, no im2col in HBM)
    s3, b3 = _fold_bn(**params["bn3"])
    t3 = conv3x3_bn_relu(t1, _w3x3_to_mat(params["conv3"], Cres_p, Cres_p),
                         _pad_vec(s3, Cres_p), _pad_vec(b3, Cres_p), stride=stride)
    Ho, Wo = t3.shape[1], t3.shape[2]

    # skip branch
    if downsample:
        ss, bs = _fold_bn(**params["skip_bn"])
        xs = xp[:, ::stride, ::stride, :].reshape(N * Ho * Wo, Cin_p)
        skip = matmul_bn(xs, _w1x1_to_mat(params["skip_conv"], Cin_p, Cout_p),
                         _pad_vec(ss, Cout_p), _pad_vec(bs, Cout_p),
                         relu=False, out_dtype=jnp.float32)
    else:
        assert stride == 1 and Cin == Cout, (
            "identity skip requires stride == 1 and in_channels == out_channels")
        skip = _pad_last(x, Cout_p).reshape(N * H * W, Cout_p)    # f32 identity skip

    # conv1x1_2 + BN + residual add + final ReLU (fully fused, f32 output)
    s2, b2 = _fold_bn(**params["bn2"])
    ret = matmul_bn(t3.reshape(N * Ho * Wo, Cres_p),
                    _w1x1_to_mat(params["conv2"], Cres_p, Cout_p),
                    _pad_vec(s2, Cout_p), _pad_vec(b2, Cout_p),
                    relu=True, out_dtype=jnp.float32, skip=skip)
    ret = ret.reshape(N, Ho, Wo, Cout_p)[..., :Cout]
    return jnp.transpose(ret, (0, 3, 1, 2))                        # back to NCHW


# ----------------------------- plain-JAX reference --------------------------- #
def _reference_forward(x, p, *, stride, downsample, storage_dtype=jnp.float32):
    # storage_dtype=jnp.bfloat16 mirrors the kernel's bf16 weight/activation storage
    # (f32 accumulation everywhere), giving an apples-to-apples check.
    def c(a):
        return a.astype(storage_dtype).astype(jnp.float32)

    def conv(x, w, s):
        return jax.lax.conv_general_dilated(
            c(x), c(w), (s, s), [(w.shape[2] // 2, w.shape[2] // 2)] * 2,
            dimension_numbers=("NCHW", "OIHW", "NCHW"))

    def bn(x, q):
        sc = q["gamma"] / jnp.sqrt(q["var"] + _EPS)
        sh = q["beta"] - q["mean"] * sc
        return x * sc[None, :, None, None] + sh[None, :, None, None]

    out = c(jax.nn.relu(bn(conv(x, p["conv1"], 1), p["bn1"])))
    out = c(jax.nn.relu(bn(conv(out, p["conv3"], stride), p["bn3"])))
    out = bn(conv(out, p["conv2"], 1), p["bn2"])
    if downsample:
        x = bn(conv(x, p["skip_conv"], stride), p["skip_bn"])
    return jax.nn.relu(out + x)


if __name__ == "__main__":
    key = jax.random.PRNGKey(0)
    k_x, k_p = jax.random.split(key)

    N, Cin, H, W = 2, 4, 16, 16
    Cres, Cout, stride, downsample = 8, 16, 2, True

    x = jax.random.normal(k_x, (N, Cin, H, W), jnp.float32)
    params = init_params(k_p, Cin, Cres, Cout, downsample)

    fwd = jax.jit(functools.partial(resnet_block_forward, stride=stride, downsample=downsample))
    y = jax.block_until_ready(fwd(x, params))

    y_ref_bf16 = _reference_forward(x, params, stride=stride, downsample=downsample,
                                    storage_dtype=jnp.bfloat16)
    y_ref_f32 = _reference_forward(x, params, stride=stride, downsample=downsample)

    assert y.shape == (N, Cout, H // stride, W // stride)
    # Check against a precision-matched (bf16 storage, f32 accumulation) reference.
    assert jnp.allclose(y, y_ref_bf16, atol=1e-2, rtol=1e-2), "mismatch vs bf16-matched reference"
    # Looser sanity check against the pure-f32 reference (bf16 storage error bound).
    assert jnp.allclose(y, y_ref_f32, atol=1e-1, rtol=1e-1), "mismatch vs f32 reference"

    print("KERNEL_OK")
</pallas_src>

<mosaic_0001>
module attributes {stable_mosaic.version = 11 : i64} {
  func.func @_matmul_bn_kernel(%arg0: i32, %arg1: i32, %arg2: i32, %arg3: memref<256x128xbf16, #tpu.memory_space<vmem>>, %arg4: memref<128x128xbf16, #tpu.memory_space<vmem>>, %arg5: memref<1x128xf32, #tpu.memory_space<vmem>>, %arg6: memref<1x128xf32, #tpu.memory_space<vmem>>, %arg7: memref<256x128xbf16, #tpu.memory_space<vmem>>, %arg8: memref<256x128xf32, #tpu.memory_space<vmem>>) attributes {dimension_semantics = [#tpu.dimension_semantics<parallel>, #tpu.dimension_semantics<parallel>, #tpu.dimension_semantics<arbitrary>], iteration_bounds = array<i64: 2, 1, 1>, scalar_prefetch = 0 : i64, scratch_operands = 1 : i64, tpu.core_type = #tpu.core_type<tc>, window_params = [{transform_indices = @transform_0, window_bounds = array<i64: 256, 128>}, {transform_indices = @transform_1, window_bounds = array<i64: 128, 128>}, {transform_indices = @transform_2, window_bounds = array<i64: 1, 128>}, {transform_indices = @transform_3, window_bounds = array<i64: 1, 128>}, {transform_indices = @transform_4, window_bounds = array<i64: 256, 128>}]} {
    %c0_i32 = arith.constant 0 : i32
    %0 = arith.cmpi eq, %arg2, %c0_i32 : i32
    %1 = arith.extui %0 : i1 to i32
    %c0_i32_0 = arith.constant 0 : i32
    %2 = arith.cmpi ne, %1, %c0_i32_0 : i32
    scf.if %2 {
      %cst_10 = arith.constant 0.000000e+00 : f32
      %12 = vector.broadcast %cst_10 : f32 to vector<256x128xf32>
      %c0_11 = arith.constant 0 : index
      %c0_12 = arith.constant 0 : index
      %13 = vector.load %arg8[%c0_11, %c0_12] : memref<256x128xf32, #tpu.memory_space<vmem>>, vector<256x128xf32>
      tpu.vector_store %arg8[%c0_11, %c0_12], %12 {strides = array<i32>} : memref<256x128xf32, #tpu.memory_space<vmem>>, vector<256x128xf32>,
    } else {
    }
    %c0 = arith.constant 0 : index
    %c0_1 = arith.constant 0 : index
    %3 = vector.load %arg8[%c0, %c0_1] : memref<256x128xf32, #tpu.memory_space<vmem>>, vector<256x128xf32>
    %c0_2 = arith.constant 0 : index
    %c0_3 = arith.constant 0 : index
    %4 = vector.load %arg3[%c0_2, %c0_3] : memref<256x128xbf16, #tpu.memory_space<vmem>>, vector<256x128xbf16>
    %c0_4 = arith.constant 0 : index
    %c0_5 = arith.constant 0 : index
    %5 = vector.load %arg4[%c0_4, %c0_5] : memref<128x128xbf16, #tpu.memory_space<vmem>>, vector<128x128xbf16>
    %cst = arith.constant dense<0.000000e+00> : vector<256x128xf32>
    %6 = tpu.matmul %4, %5, %cst {dimension_numbers = #tpu.dot_dimension_numbers<[1], [0], [0], [1], [0, 0, 1, 1], [], []>} : vector<256x128xbf16>, vector<128x128xbf16>, vector<256x128xf32> -> vector<256x128xf32>
    %7 = arith.addf %3, %6 : vector<256x128xf32>
    %c0_6 = arith.constant 0 : index
    %c0_7 = arith.constant 0 : index
    %8 = vector.load %arg8[%c0_6, %c0_7] : memref<256x128xf32, #tpu.memory_space<vmem>>, vector<256x128xf32>
    tpu.vector_store %arg8[%c0_6, %c0_7], %7 {strides = array<i32>} : memref<256x128xf32, #tpu.memory_space<vmem>>, vector<256x128xf32>,
    %c0_i32_8 = arith.constant 0 : i32
    %9 = arith.cmpi eq, %arg2, %c0_i32_8 : i32
    %10 = arith.extui %9 : i1 to i32
    %c0_i32_9 = arith.constant 0 : i32
    %11 = arith.cmpi ne, %10, %c0_i32_9 : i32
    scf.if %11 {
      %c0_10 = arith.constant 0 : index
      %c0_11 = arith.constant 0 : index
      %12 = vector.load %arg8[%c0_10, %c0_11] : memref<256x128xf32, #tpu.memory_space<vmem>>, vector<256x128xf32>
      %c0_12 = arith.constant 0 : index
      %c0_13 = arith.constant 0 : index
      %13 = vector.load %arg5[%c0_12, %c0_13] : memref<1x128xf32, #tpu.memory_space<vmem>>, vector<1x128xf32>
      %14 = vector.broadcast %13 : vector<1x128xf32> to vector<256x128xf32>
      %15 = arith.mulf %12, %14 : vector<256x128xf32>
      %c0_14 = arith.constant 0 : index
      %c0_15 = arith.constant 0 : index
      %16 = vector.load %arg6[%c0_14, %c0_15] : memref<1x128xf32, #tpu.memory_space<vmem>>, vector<1x128xf32>
      %17 = vector.broadcast %16 : vector<1x128xf32> to vector<256x128xf32>
      %18 = arith.addf %15, %17 : vector<256x128xf32>
      %cst_16 = arith.constant 0.000000e+00 : f32
      %19 = vector.broadcast %cst_16 : f32 to vector<256x128xf32>
      %20 = arith.maximumf %18, %19 : vector<256x128xf32>
      %21 = arith.truncf %20 : vector<256x128xf32> to vector<256x128xbf16>
      %c0_17 = arith.constant 0 : index
      %c0_18 = arith.constant 0 : index
      %22 = vector.load %arg7[%c0_17, %c0_18] : memref<256x128xbf16, #tpu.memory_space<vmem>>, vector<256x128xbf16>
      tpu.vector_store %arg7[%c0_17, %c0_18], %21 {strides = array<i32>} : memref<256x128xbf16, #tpu.memory_space<vmem>>, vector<256x128xbf16>,
    } else {
    }
    return
  }
  func.func @transform_0(%arg0: i32, %arg1: i32, %arg2: i32) -> (i32, i32) {
    %c0_i32 = arith.constant 0 : i32
    return %arg0, %arg2 : i32, i32
  }
  func.func @transform_1(%arg0: i32, %arg1: i32, %arg2: i32) -> (i32, i32) {
    %c0_i32 = arith.constant 0 : i32
    return %arg2, %arg1 : i32, i32
  }
  func.func @transform_2(%arg0: i32, %arg1: i32, %arg2: i32) -> (i32, i32) {
    %c0_i32 = arith.constant 0 : i32
    %c0_i32_0 = arith.constant 0 : i32
    return %c0_i32, %arg1 : i32, i32
  }
  func.func @transform_3(%arg0: i32, %arg1: i32, %arg2: i32) -> (i32, i32) {
    %c0_i32 = arith.constant 0 : i32
    %c0_i32_0 = arith.constant 0 : i32
    return %c0_i32, %arg1 : i32, i32
  }
  func.func @transform_4(%arg0: i32, %arg1: i32, %arg2: i32) -> (i32, i32) {
    %c0_i32 = arith.constant 0 : i32
    return %arg0, %arg1 : i32, i32
  }
}

module attributes {stable_mosaic.version = 11 : i64} {
  func.func @_conv3x3_kernel(%arg0: i32, %arg1: i32, %arg2: i32, %arg3: memref<1x4x9x9x128xbf16, #tpu.memory_space<vmem>>, %arg4: memref<9x128x128xbf16, #tpu.memory_space<vmem>>, %arg5: memref<1x128xf32, #tpu.memory_space<vmem>>, %arg6: memref<1x128xf32, #tpu.memory_space<vmem>>, %arg7: memref<1x8x8x128xbf16, #tpu.memory_space<vmem>>, %arg8: memref<64x128xf32, #tpu.memory_space<vmem>>) attributes {dimension_semantics = [#tpu.dimension_semantics<parallel>, #tpu.dimension_semantics<parallel>, #tpu.dimension_semantics<parallel>], iteration_bounds = array<i64: 2, 1, 1>, scalar_prefetch = 0 : i64, scratch_operands = 1 : i64, tpu.core_type = #tpu.core_type<tc>, window_params = [{transform_indices = @transform_0, window_bounds = array<i64: 1, 4, 9, 9, 128>}, {transform_indices = @transform_1, window_bounds = array<i64: 9, 128, 128>}, {transform_indices = @transform_2, window_bounds = array<i64: 1, 128>}, {transform_indices = @transform_3, window_bounds = array<i64: 1, 128>}, {transform_indices = @transform_4, window_bounds = array<i64: 1, 8, 8, 128>}]} {
    %c8_i32 = arith.constant 8 : i32
    %0 = arith.muli %arg1, %c8_i32 : i32
    %1 = tpu.assume_multiple %0, 8 : i32
    %c0_i32 = arith.constant 0 : i32
    %2 = arith.addi %1, %c0_i32 : i32
    %c0 = arith.constant 0 : index
    %c0_0 = arith.constant 0 : index
    %3 = arith.index_cast %2 : i32 to index
    %c0_1 = arith.constant 0 : index
    %c0_2 = arith.constant 0 : index
    %4 = vector.load %arg3[%c0, %c0_0, %3, %c0_1, %c0_2] : memref<1x4x9x9x128xbf16, #tpu.memory_space<vmem>>, vector<1x1x8x8x128xbf16>
    %5 = vector.shape_cast %4 : vector<1x1x8x8x128xbf16> to vector<8x8x128xbf16>
    %6 = vector.shape_cast %5 : vector<8x8x128xbf16> to vector<64x128xbf16>
    %c0_3 = arith.constant 0 : index
    %c0_4 = arith.constant 0 : index
    %c0_5 = arith.constant 0 : index
    %7 = vector.load %arg4[%c0_3, %c0_4, %c0_5] : memref<9x128x128xbf16, #tpu.memory_space<vmem>>, vector<1x128x128xbf16>
    %8 = vector.shape_cast %7 : vector<1x128x128xbf16> to vector<128x128xbf16>
    %cst = arith.constant dense<0.000000e+00> : vector<64x128xf32>
    %9 = tpu.matmul %6, %8, %cst {dimension_numbers = #tpu.dot_dimension_numbers<[1], [0], [0], [1], [0, 0, 1, 1], [], []>} : vector<64x128xbf16>, vector<128x128xbf16>, vector<64x128xf32> -> vector<64x128xf32>
    %c0_6 = arith.constant 0 : index
    %c0_7 = arith.constant 0 : index
    %10 = vector.load %arg8[%c0_6, %c0_7] : memref<64x128xf32, #tpu.memory_space<vmem>>, vector<64x128xf32>
    tpu.vector_store %arg8[%c0_6, %c0_7], %9 {strides = array<i32>} : memref<64x128xf32, #tpu.memory_space<vmem>>, vector<64x128xf32>,
    %c0_i32_8 = arith.constant 0 : i32
    %11 = arith.addi %1, %c0_i32_8 : i32
    %c0_9 = arith.constant 0 : index
    %c1 = arith.constant 1 : index
    %12 = arith.index_cast %11 : i32 to index
    %c0_10 = arith.constant 0 : index
    %c0_11 = arith.constant 0 : index
    %13 = vector.load %arg3[%c0_9, %c1, %12, %c0_10, %c0_11] : memref<1x4x9x9x128xbf16, #tpu.memory_space<vmem>>, vector<1x1x8x8x128xbf16>
    %14 = vector.shape_cast %13 : vector<1x1x8x8x128xbf16> to vector<8x8x128xbf16>
    %15 = vector.shape_cast %14 : vector<8x8x128xbf16> to vector<64x128xbf16>
    %c1_12 = arith.constant 1 : index
    %c0_13 = arith.constant 0 : index
    %c0_14 = arith.constant 0 : index
    %16 = vector.load %arg4[%c1_12, %c0_13, %c0_14] : memref<9x128x128xbf16, #tpu.memory_space<vmem>>, vector<1x128x128xbf16>
    %17 = vector.shape_cast %16 : vector<1x128x128xbf16> to vector<128x128xbf16>
    %cst_15 = arith.constant dense<0.000000e+00> : vector<64x128xf32>
    %18 = tpu.matmul %15, %17, %cst_15 {dimension_numbers = #tpu.dot_dimension_numbers<[1], [0], [0], [1], [0, 0, 1, 1], [], []>} : vector<64x128xbf16>, vector<128x128xbf16>, vector<64x128xf32> -> vector<64x128xf32>
    %c0_16 = arith.constant 0 : index
    %c0_17 = arith.constant 0 : index
    %19 = vector.load %arg8[%c0_16, %c0_17] : memref<64x128xf32, #tpu.memory_space<vmem>>, vector<64x128xf32>
    %20 = arith.addf %19, %18 : vector<64x128xf32>
    %c0_18 = arith.constant 0 : index
    %c0_19 = arith.constant 0 : index
    %21 = vector.load %arg8[%c0_18, %c0_19] : memref<64x128xf32, #tpu.memory_space<vmem>>, vector<64x128xf32>
    tpu.vector_store %arg8[%c0_18, %c0_19], %20 {strides = array<i32>} : memref<64x128xf32, #tpu.memory_space<vmem>>, vector<64x128xf32>,
    %c0_i32_20 = arith.constant 0 : i32
    %22 = arith.addi %1, %c0_i32_20 : i32
    %c0_21 = arith.constant 0 : index
    %c0_22 = arith.constant 0 : index
    %23 = arith.index_cast %22 : i32 to index
    %c1_23 = arith.constant 1 : index
    %c0_24 = arith.constant 0 : index
    %24 = vector.load %arg3[%c0_21, %c0_22, %23, %c1_23, %c0_24] : memref<1x4x9x9x128xbf16, #tpu.memory_space<vmem>>, vector<1x1x8x8x128xbf16>
    %25 = vector.shape_cast %24 : vector<1x1x8x8x128xbf16> to vector<8x8x128xbf16>
    %26 = vector.shape_cast %25 : vector<8x8x128xbf16> to vector<64x128xbf16>
    %c2 = arith.constant 2 : index
    %c0_25 = arith.constant 0 : index
    %c0_26 = arith.constant 0 : index
    %27 = vector.load %arg4[%c2, %c0_25, %c0_26] : memref<9x128x128xbf16, #tpu.memory_space<vmem>>, vector<1x128x128xbf16>
    %28 = vector.shape_cast %27 : vector<1x128x128xbf16> to vector<128x128xbf16>
    %cst_27 = arith.constant dense<0.000000e+00> : vector<64x128xf32>
    %29 = tpu.matmul %26, %28, %cst_27 {dimension_numbers = #tpu.dot_dimension_numbers<[1], [0], [0], [1], [0, 0, 1, 1], [], []>} : vector<64x128xbf16>, vector<128x128xbf16>, vector<64x128xf32> -> vector<64x128xf32>
    %c0_28 = arith.constant 0 : index
    %c0_29 = arith.constant 0 : index
    %30 = vector.load %arg8[%c0_28, %c0_29] : memref<64x128xf32, #tpu.memory_space<vmem>>, vector<64x128xf32>
    %31 = arith.addf %30, %29 : vector<64x128xf32>
    %c0_30 = arith.constant 0 : index
    %c0_31 = arith.constant 0 : index
    %32 = vector.load %arg8[%c0_30, %c0_31] : memref<64x128xf32, #tpu.memory_space<vmem>>, vector<64x128xf32>
    tpu.vector_store %arg8[%c0_30, %c0_31], %31 {strides = array<i32>} : memref<64x128xf32, #tpu.memory_space<vmem>>, vector<64x128xf32>,
    %c0_i32_32 = arith.constant 0 : i32
    %33 = arith.addi %1, %c0_i32_32 : i32
    %c0_33 = arith.constant 0 : index
    %c2_34 = arith.constant 2 : index
    %34 = arith.index_cast %33 : i32 to index
    %c0_35 = arith.constant 0 : index
    %c0_36 = arith.constant 0 : index
    %35 = vector.load %arg3[%c0_33, %c2_34, %34, %c0_35, %c0_36] : memref<1x4x9x9x128xbf16, #tpu.memory_space<vmem>>, vector<1x1x8x8x128xbf16>
    %36 = vector.shape_cast %35 : vector<1x1x8x8x128xbf16> to vector<8x8x128xbf16>
    %37 = vector.shape_cast %36 : vector<8x8x128xbf16> to vector<64x128xbf16>
    %c3 = arith.constant 3 : index
    %c0_37 = arith.constant 0 : index
    %c0_38 = arith.constant 0 : index
    %38 = vector.load %arg4[%c3, %c0_37, %c0_38] : memref<9x128x128xbf16, #tpu.memory_space<vmem>>, vector<1x128x128xbf16>
    %39 = vector.shape_cast %38 : vector<1x128x128xbf16> to vector<128x128xbf16>
    %cst_39 = arith.constant dense<0.000000e+00> : vector<64x128xf32>
    %40 = tpu.matmul %37, %39, %cst_39 {dimension_numbers = #tpu.dot_dimension_numbers<[1], [0], [0], [1], [0, 0, 1, 1], [], []>} : vector<64x128xbf16>, vector<128x128xbf16>, vector<64x128xf32> -> vector<64x128xf32>
    %c0_40 = arith.constant 0 : index
    %c0_41 = arith.constant 0 : index
    %41 = vector.load %arg8[%c0_40, %c0_41] : memref<64x128xf32, #tpu.memory_space<vmem>>, vector<64x128xf32>
    %42 = arith.addf %41, %40 : vector<64x128xf32>
    %c0_42 = arith.constant 0 : index
    %c0_43 = arith.constant 0 : index
    %43 = vector.load %arg8[%c0_42, %c0_43] : memref<64x128xf32, #tpu.memory_space<vmem>>, vector<64x128xf32>
    tpu.vector_store %arg8[%c0_42, %c0_43], %42 {strides = array<i32>} : memref<64x128xf32, #tpu.memory_space<vmem>>, vector<64x128xf32>,
    %c0_i32_44 = arith.constant 0 : i32
    %44 = arith.addi %1, %c0_i32_44 : i32
    %c0_45 = arith.constant 0 : index
    %c3_46 = arith.constant 3 : index
    %45 = arith.index_cast %44 : i32 to index
    %c0_47 = arith.constant 0 : index
    %c0_48 = arith.constant 0 : index
    %46 = vector.load %arg3[%c0_45, %c3_46, %45, %c0_47, %c0_48] : memref<1x4x9x9x128xbf16, #tpu.memory_space<vmem>>, vector<1x1x8x8x128xbf16>
    %47 = vector.shape_cast %46 : vector<1x1x8x8x128xbf16> to vector<8x8x128xbf16>
    %48 = vector.shape_cast %47 : vector<8x8x128xbf16> to vector<64x128xbf16>
    %c4 = arith.constant 4 : index
    %c0_49 = arith.constant 0 : index
    %c0_50 = arith.constant 0 : index
    %49 = vector.load %arg4[%c4, %c0_49, %c0_50] : memref<9x128x128xbf16, #tpu.memory_space<vmem>>, vector<1x128x128xbf16>
    %50 = vector.shape_cast %49 : vector<1x128x128xbf16> to vector<128x128xbf16>
    %cst_51 = arith.constant dense<0.000000e+00> : vector<64x128xf32>
    %51 = tpu.matmul %48, %50, %cst_51 {dimension_numbers = #tpu.dot_dimension_numbers<[1], [0], [0], [1], [0, 0, 1, 1], [], []>} : vector<64x128xbf16>, vector<128x128xbf16>, vector<64x128xf32> -> vector<64x128xf32>
    %c0_52 = arith.constant 0 : index
    %c0_53 = arith.constant 0 : index
    %52 = vector.load %arg8[%c0_52, %c0_53] : memref<64x128xf32, #tpu.memory_space<vmem>>, vector<64x128xf32>
    %53 = arith.addf %52, %51 : vector<64x128xf32>
    %c0_54 = arith.constant 0 : index
    %c0_55 = arith.constant 0 : index
    %54 = vector.load %arg8[%c0_54, %c0_55] : memref<64x128xf32, #tpu.memory_space<vmem>>, vector<64x128xf32>
    tpu.vector_store %arg8[%c0_54, %c0_55], %53 {strides = array<i32>} : memref<64x128xf32, #tpu.memory_space<vmem>>, vector<64x128xf32>,
    %c0_i32_56 = arith.constant 0 : i32
    %55 = arith.addi %1, %c0_i32_56 : i32
    %c0_57 = arith.constant 0 : index
    %c2_58 = arith.constant 2 : index
    %56 = arith.index_cast %55 : i32 to index
    %c1_59 = arith.constant 1 : index
    %c0_60 = arith.constant 0 : index
    %57 = vector.load %arg3[%c0_57, %c2_58, %56, %c1_59, %c0_60] : memref<1x4x9x9x128xbf16, #tpu.memory_space<vmem>>, vector<1x1x8x8x128xbf16>
    %58 = vector.shape_cast %57 : vector<1x1x8x8x128xbf16> to vector<8x8x128xbf16>
    %59 = vector.shape_cast %58 : vector<8x8x128xbf16> to vector<64x128xbf16>
    %c5 = arith.constant 5 : index
    %c0_61 = arith.constant 0 : index
    %c0_62 = arith.constant 0 : index
    %60 = vector.load %arg4[%c5, %c0_61, %c0_62] : memref<9x128x128xbf16, #tpu.memory_space<vmem>>, vector<1x128x128xbf16>
    %61 = vector.shape_cast %60 : vector<1x128x128xbf16> to vector<128x128xbf16>
    %cst_63 = arith.constant dense<0.000000e+00> : vector<64x128xf32>
    %62 = tpu.matmul %59, %61, %cst_63 {dimension_numbers = #tpu.dot_dimension_numbers<[1], [0], [0], [1], [0, 0, 1, 1], [], []>} : vector<64x128xbf16>, vector<128x128xbf16>, vector<64x128xf32> -> vector<64x128xf32>
    %c0_64 = arith.constant 0 : index
    %c0_65 = arith.constant 0 : index
    %63 = vector.load %arg8[%c0_64, %c0_65] : memref<64x128xf32, #tpu.memory_space<vmem>>, vector<64x128xf32>
    %64 = arith.addf %63, %62 : vector<64x128xf32>
    %c0_66 = arith.constant 0 : index
    %c0_67 = arith.constant 0 : index
    %65 = vector.load %arg8[%c0_66, %c0_67] : memref<64x128xf32, #tpu.memory_space<vmem>>, vector<64x128xf32>
    tpu.vector_store %arg8[%c0_66, %c0_67], %64 {strides = array<i32>} : memref<64x128xf32, #tpu.memory_space<vmem>>, vector<64x128xf32>,
    %c1_i32 = arith.constant 1 : i32
    %66 = arith.addi %1, %c1_i32 : i32
    %c0_68 = arith.constant 0 : index
    %c0_69 = arith.constant 0 : index
    %67 = arith.index_cast %66 : i32 to index
    %c0_70 = arith.constant 0 : index
    %c0_71 = arith.constant 0 : index
    %68 = vector.load %arg3[%c0_68, %c0_69, %67, %c0_70, %c0_71] : memref<1x4x9x9x128xbf16, #tpu.memory_space<vmem>>, vector<1x1x8x8x128xbf16>
    %69 = vector.shape_cast %68 : vector<1x1x8x8x128xbf16> to vector<8x8x128xbf16>
    %70 = vector.shape_cast %69 : vector<8x8x128xbf16> to vector<64x128xbf16>
    %c6 = arith.constant 6 : index
    %c0_72 = arith.constant 0 : index
    %c0_73 = arith.constant 0 : index
    %71 = vector.load %arg4[%c6, %c0_72, %c0_73] : memref<9x128x128xbf16, #tpu.memory_space<vmem>>, vector<1x128x128xbf16>
    %72 = vector.shape_cast %71 : vector<1x128x128xbf16> to vector<128x128xbf16>
    %cst_74 = arith.constant dense<0.000000e+00> : vector<64x128xf32>
    %73 = tpu.matmul %70, %72, %cst_74 {dimension_numbers = #tpu.dot_dimension_numbers<[1], [0], [0], [1], [0, 0, 1, 1], [], []>} : vector<64x128xbf16>, vector<128x128xbf16>, vector<64x128xf32> -> vector<64x128xf32>
    %c0_75 = arith.constant 0 : index
    %c0_76 = arith.constant 0 : index
    %74 = vector.load %arg8[%c0_75, %c0_76] : memref<64x128xf32, #tpu.memory_space<vmem>>, vector<64x128xf32>
    %75 = arith.addf %74, %73 : vector<64x128xf32>
    %c0_77 = arith.constant 0 : index
    %c0_78 = arith.constant 0 : index
    %76 = vector.load %arg8[%c0_77, %c0_78] : memref<64x128xf32, #tpu.memory_space<vmem>>, vector<64x128xf32>
    tpu.vector_store %arg8[%c0_77, %c0_78], %75 {strides = array<i32>} : memref<64x128xf32, #tpu.memory_space<vmem>>, vector<64x128xf32>,
    %c1_i32_79 = arith.constant 1 : i32
    %77 = arith.addi %1, %c1_i32_79 : i32
    %c0_80 = arith.constant 0 : index
    %c1_81 = arith.constant 1 : index
    %78 = arith.index_cast %77 : i32 to index
    %c0_82 = arith.constant 0 : index
    %c0_83 = arith.constant 0 : index
    %79 = vector.load %arg3[%c0_80, %c1_81, %78, %c0_82, %c0_83] : memref<1x4x9x9x128xbf16, #tpu.memory_space<vmem>>, vector<1x1x8x8x128xbf16>
    %80 = vector.shape_cast %79 : vector<1x1x8x8x128xbf16> to vector<8x8x128xbf16>
    %81 = vector.shape_cast %80 : vector<8x8x128xbf16> to vector<64x128xbf16>
    %c7 = arith.constant 7 : index
    %c0_84 = arith.constant 0 : index
    %c0_85 = arith.constant 0 : index
    %82 = vector.load %arg4[%c7, %c0_84, %c0_85] : memref<9x128x128xbf16, #tpu.memory_space<vmem>>, vector<1x128x128xbf16>
    %83 = vector.shape_cast %82 : vector<1x128x128xbf16> to vector<128x128xbf16>
    %cst_86 = arith.constant dense<0.000000e+00> : vector<64x128xf32>
    %84 = tpu.matmul %81, %83, %cst_86 {dimension_numbers = #tpu.dot_dimension_numbers<[1], [0], [0], [1], [0, 0, 1, 1], [], []>} : vector<64x128xbf16>, vector<128x128xbf16>, vector<64x128xf32> -> vector<64x128xf32>
    %c0_87 = arith.constant 0 : index
    %c0_88 = arith.constant 0 : index
    %85 = vector.load %arg8[%c0_87, %c0_88] : memref<64x128xf32, #tpu.memory_space<vmem>>, vector<64x128xf32>
    %86 = arith.addf %85, %84 : vector<64x128xf32>
    %c0_89 = arith.constant 0 : index
    %c0_90 = arith.constant 0 : index
    %87 = vector.load %arg8[%c0_89, %c0_90] : memref<64x128xf32, #tpu.memory_space<vmem>>, vector<64x128xf32>
    tpu.vector_store %arg8[%c0_89, %c0_90], %86 {strides = array<i32>} : memref<64x128xf32, #tpu.memory_space<vmem>>, vector<64x128xf32>,
    %c1_i32_91 = arith.constant 1 : i32
    %88 = arith.addi %1, %c1_i32_91 : i32
    %c0_92 = arith.constant 0 : index
    %c0_93 = arith.constant 0 : index
    %89 = arith.index_cast %88 : i32 to index
    %c1_94 = arith.constant 1 : index
    %c0_95 = arith.constant 0 : index
    %90 = vector.load %arg3[%c0_92, %c0_93, %89, %c1_94, %c0_95] : memref<1x4x9x9x128xbf16, #tpu.memory_space<vmem>>, vector<1x1x8x8x128xbf16>
    %91 = vector.shape_cast %90 : vector<1x1x8x8x128xbf16> to vector<8x8x128xbf16>
    %92 = vector.shape_cast %91 : vector<8x8x128xbf16> to vector<64x128xbf16>
    %c8 = arith.constant 8 : index
    %c0_96 = arith.constant 0 : index
    %c0_97 = arith.constant 0 : index
    %93 = vector.load %arg4[%c8, %c0_96, %c0_97] : memref<9x128x128xbf16, #tpu.memory_space<vmem>>, vector<1x128x128xbf16>
    %94 = vector.shape_cast %93 : vector<1x128x128xbf16> to vector<128x128xbf16>
    %cst_98 = arith.constant dense<0.000000e+00> : vector<64x128xf32>
    %95 = tpu.matmul %92, %94, %cst_98 {dimension_numbers = #tpu.dot_dimension_numbers<[1], [0], [0], [1], [0, 0, 1, 1], [], []>} : vector<64x128xbf16>, vector<128x128xbf16>, vector<64x128xf32> -> vector<64x128xf32>
    %c0_99 = arith.constant 0 : index
    %c0_100 = arith.constant 0 : index
    %96 = vector.load %arg8[%c0_99, %c0_100] : memref<64x128xf32, #tpu.memory_space<vmem>>, vector<64x128xf32>
    %97 = arith.addf %96, %95 : vector<64x128xf32>
    %c0_101 = arith.constant 0 : index
    %c0_102 = arith.constant 0 : index
    %98 = vector.load %arg8[%c0_101, %c0_102] : memref<64x128xf32, #tpu.memory_space<vmem>>, vector<64x128xf32>
    tpu.vector_store %arg8[%c0_101, %c0_102], %97 {strides = array<i32>} : memref<64x128xf32, #tpu.memory_space<vmem>>, vector<64x128xf32>,
    %c0_103 = arith.constant 0 : index
    %c0_104 = arith.constant 0 : index
    %99 = vector.load %arg8[%c0_103, %c0_104] : memref<64x128xf32, #tpu.memory_space<vmem>>, vector<64x128xf32>
    %c0_105 = arith.constant 0 : index
    %c0_106 = arith.constant 0 : index
    %100 = vector.load %arg5[%c0_105, %c0_106] : memref<1x128xf32, #tpu.memory_space<vmem>>, vector<1x128xf32>
    %101 = vector.broadcast %100 : vector<1x128xf32> to vector<64x128xf32>
    %102 = arith.mulf %99, %101 : vector<64x128xf32>
    %c0_107 = arith.constant 0 : index
    %c0_108 = arith.constant 0 : index
    %103 = vector.load %arg6[%c0_107, %c0_108] : memref<1x128xf32, #tpu.memory_space<vmem>>, vector<1x128xf32>
    %104 = vector.broadcast %103 : vector<1x128xf32> to vector<64x128xf32>
    %105 = arith.addf %102, %104 : vector<64x128xf32>
    %cst_109 = arith.constant 0.000000e+00 : f32
    %106 = vector.broadcast %cst_109 : f32 to vector<64x128xf32>
    %107 = arith.maximumf %105, %106 : vector<64x128xf32>
    %108 = vector.shape_cast %107 : vector<64x128xf32> to vector<1x8x8x128xf32>
    %109 = arith.truncf %108 : vector<1x8x8x128xf32> to vector<1x8x8x128xbf16>
    %c0_110 = arith.constant 0 : index
    %c0_111 = arith.constant 0 : index
    %c0_112 = arith.constant 0 : index
    %c0_113 = arith.constant 0 : index
    %110 = vector.load %arg7[%c0_110, %c0_111, %c0_112, %c0_113] : memref<1x8x8x128xbf16, #tpu.memory_space<vmem>>, vector<1x8x8x128xbf16>
    tpu.vector_store %arg7[%c0_110, %c0_111, %c0_112, %c0_113], %109 {strides = array<i32>} : memref<1x8x8x128xbf16, #tpu.memory_space<vmem>>, vector<1x8x8x128xbf16>,
    return
  }
  func.func @transform_0(%arg0: i32, %arg1: i32, %arg2: i32) -> (i32, i32, i32, i32, i32) {
    %c0_i32 = arith.constant 0 : i32
    %c0_i32_0 = arith.constant 0 : i32
    %c0_i32_1 = arith.constant 0 : i32
    %c0_i32_2 = arith.constant 0 : i32
    %c0_i32_3 = arith.constant 0 : i32
    return %arg0, %c0_i32, %c0_i32_0, %c0_i32_1, %c0_i32_2 : i32, i32, i32, i32, i32
  }
  func.func @transform_1(%arg0: i32, %arg1: i32, %arg2: i32) -> (i32, i32, i32) {
    %c0_i32 = arith.constant 0 : i32
    %c0_i32_0 = arith.constant 0 : i32
    %c0_i32_1 = arith.constant 0 : i32
    return %c0_i32, %c0_i32_0, %arg2 : i32, i32, i32
  }
  func.func @transform_2(%arg0: i32, %arg1: i32, %arg2: i32) -> (i32, i32) {
    %c0_i32 = arith.constant 0 : i32
    %c0_i32_0 = arith.constant 0 : i32
    return %c0_i32, %arg2 : i32, i32
  }
  func.func @transform_3(%arg0: i32, %arg1: i32, %arg2: i32) -> (i32, i32) {
    %c0_i32 = arith.constant 0 : i32
    %c0_i32_0 = arith.constant 0 : i32
    return %c0_i32, %arg2 : i32, i32
  }
  func.func @transform_4(%arg0: i32, %arg1: i32, %arg2: i32) -> (i32, i32, i32, i32) {
    %c0_i32 = arith.constant 0 : i32
    %c0_i32_0 = arith.constant 0 : i32
    return %arg0, %arg1, %c0_i32, %arg2 : i32, i32, i32, i32
  }
}

module attributes {stable_mosaic.version = 11 : i64} {
  func.func @_matmul_bn_kernel(%arg0: i32, %arg1: i32, %arg2: i32, %arg3: memref<128x128xbf16, #tpu.memory_space<vmem>>, %arg4: memref<128x128xbf16, #tpu.memory_space<vmem>>, %arg5: memref<1x128xf32, #tpu.memory_space<vmem>>, %arg6: memref<1x128xf32, #tpu.memory_space<vmem>>, %arg7: memref<128x128xf32, #tpu.memory_space<vmem>>, %arg8: memref<128x128xf32, #tpu.memory_space<vmem>>) attributes {dimension_semantics = [#tpu.dimension_semantics<parallel>, #tpu.dimension_semantics<parallel>, #tpu.dimension_semantics<arbitrary>], iteration_bounds = array<i64: 1, 1, 1>, scalar_prefetch = 0 : i64, scratch_operands = 1 : i64, tpu.core_type = #tpu.core_type<tc>, window_params = [{transform_indices = @transform_0, window_bounds = array<i64: 128, 128>}, {transform_indices = @transform_1, window_bounds = array<i64: 128, 128>}, {transform_indices = @transform_2, window_bounds = array<i64: 1, 128>}, {transform_indices = @transform_3, window_bounds = array<i64: 1, 128>}, {transform_indices = @transform_4, window_bounds = array<i64: 128, 128>}]} {
    %c0_i32 = arith.constant 0 : i32
    %0 = arith.cmpi eq, %arg2, %c0_i32 : i32
    %1 = arith.extui %0 : i1 to i32
    %c0_i32_0 = arith.constant 0 : i32
    %2 = arith.cmpi ne, %1, %c0_i32_0 : i32
    scf.if %2 {
      %cst_10 = arith.constant 0.000000e+00 : f32
      %12 = vector.broadcast %cst_10 : f32 to vector<128x128xf32>
      %c0_11 = arith.constant 0 : index
      %c0_12 = arith.constant 0 : index
      %13 = vector.load %arg8[%c0_11, %c0_12] : memref<128x128xf32, #tpu.memory_space<vmem>>, vector<128x128xf32>
      tpu.vector_store %arg8[%c0_11, %c0_12], %12 {strides = array<i32>} : memref<128x128xf32, #tpu.memory_space<vmem>>, vector<128x128xf32>,
    } else {
    }
    %c0 = arith.constant 0 : index
    %c0_1 = arith.constant 0 : index
    %3 = vector.load %arg8[%c0, %c0_1] : memref<128x128xf32, #tpu.memory_space<vmem>>, vector<128x128xf32>
    %c0_2 = arith.constant 0 : index
    %c0_3 = arith.constant 0 : index
    %4 = vector.load %arg3[%c0_2, %c0_3] : memref<128x128xbf16, #tpu.memory_space<vmem>>, vector<128x128xbf16>
    %c0_4 = arith.constant 0 : index
    %c0_5 = arith.constant 0 : index
    %5 = vector.load %arg4[%c0_4, %c0_5] : memref<128x128xbf16, #tpu.memory_space<vmem>>, vector<128x128xbf16>
    %cst = arith.constant dense<0.000000e+00> : vector<128x128xf32>
    %6 = tpu.matmul %4, %5, %cst {dimension_numbers = #tpu.dot_dimension_numbers<[1], [0], [0], [1], [0, 0, 1, 1], [], []>} : vector<128x128xbf16>, vector<128x128xbf16>, vector<128x128xf32> -> vector<128x128xf32>
    %7 = arith.addf %3, %6 : vector<128x128xf32>
    %c0_6 = arith.constant 0 : index
    %c0_7 = arith.constant 0 : index
    %8 = vector.load %arg8[%c0_6, %c0_7] : memref<128x128xf32, #tpu.memory_space<vmem>>, vector<128x128xf32>
    tpu.vector_store %arg8[%c0_6, %c0_7], %7 {strides = array<i32>} : memref<128x128xf32, #tpu.memory_space<vmem>>, vector<128x128xf32>,
    %c0_i32_8 = arith.constant 0 : i32
    %9 = arith.cmpi eq, %arg2, %c0_i32_8 : i32
    %10 = arith.extui %9 : i1 to i32
    %c0_i32_9 = arith.constant 0 : i32
    %11 = arith.cmpi ne, %10, %c0_i32_9 : i32
    scf.if %11 {
      %c0_10 = arith.constant 0 : index
      %c0_11 = arith.constant 0 : index
      %12 = vector.load %arg8[%c0_10, %c0_11] : memref<128x128xf32, #tpu.memory_space<vmem>>, vector<128x128xf32>
      %c0_12 = arith.constant 0 : index
      %c0_13 = arith.constant 0 : index
      %13 = vector.load %arg5[%c0_12, %c0_13] : memref<1x128xf32, #tpu.memory_space<vmem>>, vector<1x128xf32>
      %14 = vector.broadcast %13 : vector<1x128xf32> to vector<128x128xf32>
      %15 = arith.mulf %12, %14 : vector<128x128xf32>
      %c0_14 = arith.constant 0 : index
      %c0_15 = arith.constant 0 : index
      %16 = vector.load %arg6[%c0_14, %c0_15] : memref<1x128xf32, #tpu.memory_space<vmem>>, vector<1x128xf32>
      %17 = vector.broadcast %16 : vector<1x128xf32> to vector<128x128xf32>
      %18 = arith.addf %15, %17 : vector<128x128xf32>
      %c0_16 = arith.constant 0 : index
      %c0_17 = arith.constant 0 : index
      %19 = vector.load %arg7[%c0_16, %c0_17] : memref<128x128xf32, #tpu.memory_space<vmem>>, vector<128x128xf32>
      tpu.vector_store %arg7[%c0_16, %c0_17], %18 {strides = array<i32>} : memref<128x128xf32, #tpu.memory_space<vmem>>, vector<128x128xf32>,
    } else {
    }
    return
  }
  func.func @transform_0(%arg0: i32, %arg1: i32, %arg2: i32) -> (i32, i32) {
    %c0_i32 = arith.constant 0 : i32
    return %arg0, %arg2 : i32, i32
  }
  func.func @transform_1(%arg0: i32, %arg1: i32, %arg2: i32) -> (i32, i32) {
    %c0_i32 = arith.constant 0 : i32
    return %arg2, %arg1 : i32, i32
  }
  func.func @transform_2(%arg0: i32, %arg1: i32, %arg2: i32) -> (i32, i32) {
    %c0_i32 = arith.constant 0 : i32
    %c0_i32_0 = arith.constant 0 : i32
    return %c0_i32, %arg1 : i32, i32
  }
  func.func @transform_3(%arg0: i32, %arg1: i32, %arg2: i32) -> (i32, i32) {
    %c0_i32 = arith.constant 0 : i32
    %c0_i32_0 = arith.constant 0 : i32
    return %c0_i32, %arg1 : i32, i32
  }
  func.func @transform_4(%arg0: i32, %arg1: i32, %arg2: i32) -> (i32, i32) {
    %c0_i32 = arith.constant 0 : i32
    return %arg0, %arg1 : i32, i32
  }
}

module attributes {stable_mosaic.version = 11 : i64} {
  func.func @_matmul_bn_add_relu_kernel(%arg0: i32, %arg1: i32, %arg2: i32, %arg3: memref<128x128xbf16, #tpu.memory_space<vmem>>, %arg4: memref<128x128xbf16, #tpu.memory_space<vmem>>, %arg5: memref<1x128xf32, #tpu.memory_space<vmem>>, %arg6: memref<1x128xf32, #tpu.memory_space<vmem>>, %arg7: memref<128x128xf32, #tpu.memory_space<vmem>>, %arg8: memref<128x128xf32, #tpu.memory_space<vmem>>, %arg9: memref<128x128xf32, #tpu.memory_space<vmem>>) attributes {dimension_semantics = [#tpu.dimension_semantics<parallel>, #tpu.dimension_semantics<parallel>, #tpu.dimension_semantics<arbitrary>], iteration_bounds = array<i64: 1, 1, 1>, scalar_prefetch = 0 : i64, scratch_operands = 1 : i64, tpu.core_type = #tpu.core_type<tc>, window_params = [{transform_indices = @transform_0, window_bounds = array<i64: 128, 128>}, {transform_indices = @transform_1, window_bounds = array<i64: 128, 128>}, {transform_indices = @transform_2, window_bounds = array<i64: 1, 128>}, {transform_indices = @transform_3, window_bounds = array<i64: 1, 128>}, {transform_indices = @transform_4, window_bounds = array<i64: 128, 128>}, {transform_indices = @transform_5, window_bounds = array<i64: 128, 128>}]} {
    %c0_i32 = arith.constant 0 : i32
    %0 = arith.cmpi eq, %arg2, %c0_i32 : i32
    %1 = arith.extui %0 : i1 to i32
    %c0_i32_0 = arith.constant 0 : i32
    %2 = arith.cmpi ne, %1, %c0_i32_0 : i32
    scf.if %2 {
      %cst_10 = arith.constant 0.000000e+00 : f32
      %12 = vector.broadcast %cst_10 : f32 to vector<128x128xf32>
      %c0_11 = arith.constant 0 : index
      %c0_12 = arith.constant 0 : index
      %13 = vector.load %arg9[%c0_11, %c0_12] : memref<128x128xf32, #tpu.memory_space<vmem>>, vector<128x128xf32>
      tpu.vector_store %arg9[%c0_11, %c0_12], %12 {strides = array<i32>} : memref<128x128xf32, #tpu.memory_space<vmem>>, vector<128x128xf32>,
    } else {
    }
    %c0 = arith.constant 0 : index
    %c0_1 = arith.constant 0 : index
    %3 = vector.load %arg9[%c0, %c0_1] : memref<128x128xf32, #tpu.memory_space<vmem>>, vector<128x128xf32>
    %c0_2 = arith.constant 0 : index
    %c0_3 = arith.constant 0 : index
    %4 = vector.load %arg3[%c0_2, %c0_3] : memref<128x128xbf16, #tpu.memory_space<vmem>>, vector<128x128xbf16>
    %c0_4 = arith.constant 0 : index
    %c0_5 = arith.constant 0 : index
    %5 = vector.load %arg4[%c0_4, %c0_5] : memref<128x128xbf16, #tpu.memory_space<vmem>>, vector<128x128xbf16>
    %cst = arith.constant dense<0.000000e+00> : vector<128x128xf32>
    %6 = tpu.matmul %4, %5, %cst {dimension_numbers = #tpu.dot_dimension_numbers<[1], [0], [0], [1], [0, 0, 1, 1], [], []>} : vector<128x128xbf16>, vector<128x128xbf16>, vector<128x128xf32> -> vector<128x128xf32>
    %7 = arith.addf %3, %6 : vector<128x128xf32>
    %c0_6 = arith.constant 0 : index
    %c0_7 = arith.constant 0 : index
    %8 = vector.load %arg9[%c0_6, %c0_7] : memref<128x128xf32, #tpu.memory_space<vmem>>, vector<128x128xf32>
    tpu.vector_store %arg9[%c0_6, %c0_7], %7 {strides = array<i32>} : memref<128x128xf32, #tpu.memory_space<vmem>>, vector<128x128xf32>,
    %c0_i32_8 = arith.constant 0 : i32
    %9 = arith.cmpi eq, %arg2, %c0_i32_8 : i32
    %10 = arith.extui %9 : i1 to i32
    %c0_i32_9 = arith.constant 0 : i32
    %11 = arith.cmpi ne, %10, %c0_i32_9 : i32
    scf.if %11 {
      %c0_10 = arith.constant 0 : index
      %c0_11 = arith.constant 0 : index
      %12 = vector.load %arg9[%c0_10, %c0_11] : memref<128x128xf32, #tpu.memory_space<vmem>>, vector<128x128xf32>
      %c0_12 = arith.constant 0 : index
      %c0_13 = arith.constant 0 : index
      %13 = vector.load %arg5[%c0_12, %c0_13] : memref<1x128xf32, #tpu.memory_space<vmem>>, vector<1x128xf32>
      %14 = vector.broadcast %13 : vector<1x128xf32> to vector<128x128xf32>
      %15 = arith.mulf %12, %14 : vector<128x128xf32>
      %c0_14 = arith.constant 0 : index
      %c0_15 = arith.constant 0 : index
      %16 = vector.load %arg6[%c0_14, %c0_15] : memref<1x128xf32, #tpu.memory_space<vmem>>, vector<1x128xf32>
      %17 = vector.broadcast %16 : vector<1x128xf32> to vector<128x128xf32>
      %18 = arith.addf %15, %17 : vector<128x128xf32>
      %c0_16 = arith.constant 0 : index
      %c0_17 = arith.constant 0 : index
      %19 = vector.load %arg7[%c0_16, %c0_17] : memref<128x128xf32, #tpu.memory_space<vmem>>, vector<128x128xf32>
      %20 = arith.addf %18, %19 : vector<128x128xf32>
      %cst_18 = arith.constant 0.000000e+00 : f32
      %21 = vector.broadcast %cst_18 : f32 to vector<128x128xf32>
      %22 = arith.maximumf %20, %21 : vector<128x128xf32>
      %c0_19 = arith.constant 0 : index
      %c0_20 = arith.constant 0 : index
      %23 = vector.load %arg8[%c0_19, %c0_20] : memref<128x128xf32, #tpu.memory_space<vmem>>, vector<128x128xf32>
      tpu.vector_store %arg8[%c0_19, %c0_20], %22 {strides = array<i32>} : memref<128x128xf32, #tpu.memory_space<vmem>>, vector<128x128xf32>,
    } else {
    }
    return
  }
  func.func @transform_0(%arg0: i32, %arg1: i32, %arg2: i32) -> (i32, i32) {
    %c0_i32 = arith.constant 0 : i32
    return %arg0, %arg2 : i32, i32
  }
  func.func @transform_1(%arg0: i32, %arg1: i32, %arg2: i32) -> (i32, i32) {
    %c0_i32 = arith.constant 0 : i32
    return %arg2, %arg1 : i32, i32
  }
  func.func @transform_2(%arg0: i32, %arg1: i32, %arg2: i32) -> (i32, i32) {
    %c0_i32 = arith.constant 0 : i32
    %c0_i32_0 = arith.constant 0 : i32
    return %c0_i32, %arg1 : i32, i32
  }
  func.func @transform_3(%arg0: i32, %arg1: i32, %arg2: i32) -> (i32, i32) {
    %c0_i32 = arith.constant 0 : i32
    %c0_i32_0 = arith.constant 0 : i32
    return %c0_i32, %arg1 : i32, i32
  }
  func.func @transform_4(%arg0: i32, %arg1: i32, %arg2: i32) -> (i32, i32) {
    %c0_i32 = arith.constant 0 : i32
    return %arg0, %arg1 : i32, i32
  }
  func.func @transform_5(%arg0: i32, %arg1: i32, %arg2: i32) -> (i32, i32) {
    %c0_i32 = arith.constant 0 : i32
    return %arg0, %arg1 : i32, i32
  }
}

</mosaic_0001>

<bundles_post_ra>
// kernel: resnet_block_forward.4
= control target key start
LH: loop header
LB: loop body
LE: loop exit
PB: predicated region body
PF: predicated region fallthrough
CT: control target
= control target key end

     0   :  { %s1367_s15 = smov 0   ;;  %s1369_s16 = smov 0   ;;  %s1544_s0 = inlined_call_operand.vmem [shape: bf16[512,128], index: 0, kind: input, shape index: {}]   ;;  %s1545_s1 = inlined_call_operand.vmem [shape: bf16[128,128], index: 1, kind: input, shape index: {}]   ;;  %s1546_s2 = inlined_call_operand.vmem [shape: f32[1,128], index: 2, kind: input, shape index: {}]   ;;  %s1547_s3 = inlined_call_operand.vmem [shape: f32[1,128], index: 3, kind: input, shape index: {}]   ;;  %s1548_s4 = inlined_call_operand.vmem [shape: bf16[512,128], index: 4, kind: output, shape index: {}]  }
   0x1   :  { %s1371_s17 = smov 0  }
   0x2 LB: > { %s33_s18 = sadd.s32 1, %s1336_s16  ;;  %p1046_p0 = scmp.ge.s32.totalorder %s1340_s17, 1  ;;  %s1340_s17 = sphi %s1371_s17, %s14_s17   ;;  %s1336_s16 = sphi %s1369_s16, %s1550_s16   ;;  %s1332_s15 = sphi %s1367_s15, %s1549_s15  }
   0x3   : > { %p35_p1 = scmp.ge.s32.totalorder %s33_s18, 2  ;;  %p221_p2 = scmp.lt.s32.totalorder %s1340_s17, 3 }
   0x5   : > { %s1552_s18 = smov (%p35_p1, %s33_s18), 0  ;;  %p222_p3 = pnand %p1046_p0, %p221_p2 }
   0x6   : > { %s1047_s27 = sshll.u32 (!%p222_p3), %s1332_s15, 5 }
   0x7   : > { %225 = sbr.rel (%p222_p3) target bundleno = 243 (0xf3), region = 36  ;;  %p268_p4 = scmp.lt.s32.totalorder (!%p222_p3), %s1047_s27, 63 }
   0xc   : > { %v1172_v0 = vld [vmem:[%s1545_s1 + $0x38] sm:$0xff]  ;;  %v1171_v1 = vld [vmem:[%s1545_s1 + $0x30] sm:$0xff]  ;;  %v1170_v2 = vld [vmem:[%s1545_s1 + $0x28] sm:$0xff]  ;;  %s1554_s27 = smov (!%p268_p4, %s1047_s27), 63 }
   0xd   : > { %560 = vmatpush.bf16.msra.mxu0 %v1172_v0  ;;  %1268 = vmatpush.bf16.msra.mxu1 %v1172_v0  ;;  %v1169_v3 = vld [vmem:[%s1545_s1 + $0x20] sm:$0xff]  ;;  %v1168_v4 = vld [vmem:[%s1545_s1 + $0x18] sm:$0xff]  ;;  %v1167_v5 = vld [vmem:[%s1545_s1 + $0x10] sm:$0xff]  ;;  %s1048_s8 = sshll.u32 %s1554_s27, 2 }
   0xe   : > { %1269 = vmatpush.bf16.msra.mxu2 %v1172_v0  ;;  %1270 = vmatpush.bf16.msra.mxu3 %v1172_v0  ;;  %v1166_v6 = vld [vmem:[%s1545_s1 + $0x8] sm:$0xff]  ;;  %v1165_v7 = vld [vmem:[%s1545_s1] sm:$0xff]  ;;  %s1420_s13 = scalar_lea.vmem %s1544_s0, %s1048_s8  ;;  %s1463_s23 = scalar_lea.vmem %s1548_s4, %s1048_s8 }
   0xf   : > { %v1149_v8 = vld [vmem:[%s1420_s13] sm:$0xff]  ;;  %v1150_v12 = vld [vmem:[%s1420_s13 + $0x8] sm:$0xff]  ;;  %v1151_v16 = vld [vmem:[%s1420_s13 + $0x10] sm:$0xff] }
  0x10   : > { %v1153_v9 = vld [vmem:[%s1420_s13 + $0x20] sm:$0xff]  ;;  %v1154_v13 = vld [vmem:[%s1420_s13 + $0x28] sm:$0xff]  ;;  %v1155_v17 = vld [vmem:[%s1420_s13 + $0x30] sm:$0xff] }
  0x11   : > { %561 = vmatpush.bf16.msra.mxu0 %v1171_v1  ;;  %1271 = vmatpush.bf16.msra.mxu1 %v1171_v1  ;;  %v1157_v10 = vld [vmem:[%s1420_s13 + $0x40] sm:$0xff]  ;;  %v1158_v14 = vld [vmem:[%s1420_s13 + $0x48] sm:$0xff]  ;;  %v1159_v18 = vld [vmem:[%s1420_s13 + $0x50] sm:$0xff] }
  0x12   : > { %1272 = vmatpush.bf16.msra.mxu2 %v1171_v1  ;;  %1273 = vmatpush.bf16.msra.mxu3 %v1171_v1  ;;  %v1161_v11 = vld [vmem:[%s1420_s13 + $0x60] sm:$0xff]  ;;  %v1162_v15 = vld [vmem:[%s1420_s13 + $0x68] sm:$0xff]  ;;  %v1163_v19 = vld [vmem:[%s1420_s13 + $0x70] sm:$0xff] }
  0x13   : > { %v1152_v20 = vld [vmem:[%s1420_s13 + $0x18] sm:$0xff]  ;;  %v1441_v26 = vld [vmem:[%s1546_s2] ss:$0 sm:$0xff] }
  0x14   : > { %v1156_v21 = vld [vmem:[%s1420_s13 + $0x38] sm:$0xff]  ;;  %v1447_v28 = vld [vmem:[%s1547_s3] ss:$0 sm:$0xff] }
  0x15   : > { %562 = vmatpush.bf16.msra.mxu0 %v1170_v2  ;;  %1274 = vmatpush.bf16.msra.mxu1 %v1170_v2  ;;  %v1160_v22 = vld [vmem:[%s1420_s13 + $0x58] sm:$0xff] }
  0x16   : > { %1275 = vmatpush.bf16.msra.mxu2 %v1170_v2  ;;  %1276 = vmatpush.bf16.msra.mxu3 %v1170_v2  ;;  %v1164_v23 = vld [vmem:[%s1420_s13 + $0x78] sm:$0xff] }
  0x19   : > { %563 = vmatpush.bf16.msra.mxu0 %v1169_v3  ;;  %1277 = vmatpush.bf16.msra.mxu1 %v1169_v3 }
  0x1a   : > { %1278 = vmatpush.bf16.msra.mxu2 %v1169_v3  ;;  %1279 = vmatpush.bf16.msra.mxu3 %v1169_v3 }
  0x1d   : > { %564 = vmatpush.bf16.msra.mxu0 %v1168_v4  ;;  %1280 = vmatpush.bf16.msra.mxu1 %v1168_v4 }
  0x1e   : > { %1281 = vmatpush.bf16.msra.mxu2 %v1168_v4  ;;  %1282 = vmatpush.bf16.msra.mxu3 %v1168_v4 }
  0x21   : > { %565 = vmatpush.bf16.msra.mxu0 %v1167_v5  ;;  %1283 = vmatpush.bf16.msra.mxu1 %v1167_v5 }
  0x22   : > { %1284 = vmatpush.bf16.msra.mxu2 %v1167_v5  ;;  %1285 = vmatpush.bf16.msra.mxu3 %v1167_v5 }
  0x25   : > { %566 = vmatpush.bf16.msra.mxu0 %v1166_v6  ;;  %1286 = vmatpush.bf16.msra.mxu1 %v1166_v6 }
  0x26   : > { %1287 = vmatpush.bf16.msra.mxu2 %v1166_v6  ;;  %1288 = vmatpush.bf16.msra.mxu3 %v1166_v6 }
  0x29   : > { %567 = vmatpush.bf16.msra.mxu0 %v1165_v7  ;;  %1289 = vmatpush.bf16.msra.mxu1 %v1165_v7 }
  0x2a   : > { %1290 = vmatpush.bf16.msra.mxu2 %v1165_v7  ;;  %1291 = vmatpush.bf16.msra.mxu3 %v1165_v7 }
  0x2c   : > { %568 = vmatmul.bf16.vlgmr.msra.gmra.mxu0 %v1149_v8  ;;  %588 = vmatmul.bf16.vlgmr.msra.gmra.mxu1 %v1153_v9 }
  0x2d   : > { %608 = vmatmul.bf16.vlgmr.msra.gmra.mxu2 %v1157_v10  ;;  %628 = vmatmul.bf16.vlgmr.msra.gmra.mxu3 %v1161_v11 }
  0x3c   : > { %573 = vmatmul.bf16.gmra.mxu0 %v1150_v12  ;;  %593 = vmatmul.bf16.gmra.mxu1 %v1154_v13 }
  0x3d   : > { %613 = vmatmul.bf16.gmra.mxu2 %v1158_v14  ;;  %633 = vmatmul.bf16.gmra.mxu3 %v1162_v15 }
  0x4c   : > { %578 = vmatmul.bf16.gmra.mxu0 %v1151_v16  ;;  %598 = vmatmul.bf16.gmra.mxu1 %v1155_v17 }
  0x4d   : > { %618 = vmatmul.bf16.gmra.mxu2 %v1159_v18  ;;  %638 = vmatmul.bf16.gmra.mxu3 %v1163_v19 }
  0x5c   : > { %583 = vmatmul.bf16.gmra.mxu0 %v1152_v20  ;;  %603 = vmatmul.bf16.gmra.mxu1 %v1156_v21 }
  0x5d   : > { %623 = vmatmul.bf16.gmra.mxu2 %v1160_v22  ;;  %643 = vmatmul.bf16.gmra.mxu3 %v1164_v23 }
  0xa9   : > { %v569_v24 = vpop.f32.mrf.mxu0  ;;  %v589_v25 = vpop.f32.mrf.mxu1 }
  0xaa   : > { %v752_v27 = vmul.f32 %v1441_v26, %v569_v24  ;;  %v760_v29 = vmul.f32 %v1441_v26, %v589_v25 }
  0xac   : > { %v788_v34 = vadd.f32 %v1447_v28, %v752_v27  ;;  %v796_v35 = vadd.f32 %v1447_v28, %v760_v29 }
  0xae   : > { %v820_v42 = vmax.f32 %v788_v34, 0.0  ;;  %v828_v43 = vmax.f32 %v796_v35, 0.0 }
  0xb0   : > { %v609_v30 = vpop.f32.mrf.mxu2  ;;  %v629_v31 = vpop.f32.mrf.mxu3 }
  0xb1   : > { %v571_v32 = vpop.f32.mrf.mxu0  ;;  %v591_v33 = vpop.f32.mrf.mxu1  ;;  %v768_v40 = vmul.f32 %v1441_v26, %v609_v30  ;;  %v776_v41 = vmul.f32 %v1441_v26, %v629_v31 }
  0xb2   : > { %v753_v36 = vmul.f32 %v1441_v26, %v571_v32  ;;  %v761_v37 = vmul.f32 %v1441_v26, %v591_v33 }
  0xb3   : > { %v804_v50 = vadd.f32 %v1447_v28, %v768_v40  ;;  %v812_v51 = vadd.f32 %v1447_v28, %v776_v41 }
  0xb4   : > { %v789_v38 = vadd.f32 %v1447_v28, %v753_v36  ;;  %v797_v39 = vadd.f32 %v1447_v28, %v761_v37 }
  0xb5   : > { %v836_v58 = vmax.f32 %v804_v50, 0.0  ;;  %v844_v59 = vmax.f32 %v812_v51, 0.0 }
  0xb6   : > { %v821_v44 = vmax.f32 %v789_v38, 0.0  ;;  %v829_v45 = vmax.f32 %v797_v39, 0.0 }
  0xb8   : > { %v1176_v46 = vpack.c.bf16 %v821_v44, %v820_v42  ;;  %v1196_v47 = vpack.c.bf16 %v829_v45, %v828_v43  ;;  %v611_v48 = vpop.f32.mrf.mxu2  ;;  %v631_v49 = vpop.f32.mrf.mxu3 }
  0xb9   : > { %v769_v52 = vmul.f32 %v1441_v26, %v611_v48  ;;  %v777_v53 = vmul.f32 %v1441_v26, %v631_v49  ;;  %v574_v54 = vpop.f32.mrf.mxu0  ;;  %v594_v55 = vpop.f32.mrf.mxu1 }
  0xba   : > { %1177 = vst [vmem:[%s1463_s23] sm:$0xff] %v1176_v46   ;;  %v754_v62 = vmul.f32 %v1441_v26, %v574_v54  ;;  %v762_v63 = vmul.f32 %v1441_v26, %v594_v55 }
  0xbb   : > { %1256 = vst [vmem:[%s1463_s23 + $0x20] sm:$0xff] %v1196_v47   ;;  %v805_v56 = vadd.f32 %v1447_v28, %v769_v52  ;;  %v813_v57 = vadd.f32 %v1447_v28, %v777_v53 }
  0xbc   : > { %v790_v6 = vadd.f32 %v1447_v28, %v754_v62  ;;  %v798_v7 = vadd.f32 %v1447_v28, %v762_v63 }
  0xbd   : > { %v837_v60 = vmax.f32 %v805_v56, 0.0  ;;  %v845_v61 = vmax.f32 %v813_v57, 0.0 }
  0xbe   : > { %v822_v14 = vmax.f32 %v790_v6, 0.0  ;;  %v830_v15 = vmax.f32 %v798_v7, 0.0 }
  0xbf   : > { %v1216_v0 = vpack.c.bf16 %v837_v60, %v836_v58  ;;  %v1236_v1 = vpack.c.bf16 %v845_v61, %v844_v59 }
  0xc0   : > { %v614_v2 = vpop.f32.mrf.mxu2  ;;  %v634_v3 = vpop.f32.mrf.mxu3 }
  0xc1   : > { %1260 = vst [vmem:[%s1463_s23 + $0x40] sm:$0xff] %v1216_v0   ;;  %v576_v4 = vpop.f32.mrf.mxu0  ;;  %v596_v5 = vpop.f32.mrf.mxu1  ;;  %v770_v12 = vmul.f32 %v1441_v26, %v614_v2  ;;  %v778_v13 = vmul.f32 %v1441_v26, %v634_v3 }
  0xc2   : > { %1264 = vst [vmem:[%s1463_s23 + $0x60] sm:$0xff] %v1236_v1   ;;  %v755_v8 = vmul.f32 %v1441_v26, %v576_v4  ;;  %v763_v9 = vmul.f32 %v1441_v26, %v596_v5 }
  0xc3   : > { %v806_v22 = vadd.f32 %v1447_v28, %v770_v12  ;;  %v814_v23 = vadd.f32 %v1447_v28, %v778_v13 }
  0xc4   : > { %v791_v10 = vadd.f32 %v1447_v28, %v755_v8  ;;  %v799_v11 = vadd.f32 %v1447_v28, %v763_v9 }
  0xc5   : > { %v838_v32 = vmax.f32 %v806_v22, 0.0  ;;  %v846_v33 = vmax.f32 %v814_v23, 0.0 }
  0xc6   : > { %v823_v16 = vmax.f32 %v791_v10, 0.0  ;;  %v831_v17 = vmax.f32 %v799_v11, 0.0 }
  0xc8   : > { %v1181_v18 = vpack.c.bf16 %v823_v16, %v822_v14  ;;  %v1201_v19 = vpack.c.bf16 %v831_v17, %v830_v15  ;;  %v616_v20 = vpop.f32.mrf.mxu2  ;;  %v636_v21 = vpop.f32.mrf.mxu3 }
  0xc9   : > { %v771_v24 = vmul.f32 %v1441_v26, %v616_v20  ;;  %v779_v25 = vmul.f32 %v1441_v26, %v636_v21  ;;  %v579_v27 = vpop.f32.mrf.mxu0  ;;  %v599_v29 = vpop.f32.mrf.mxu1 }
  0xca   : > { %1253 = vst [vmem:[%s1463_s23 + $0x8] sm:$0xff] %v1181_v18   ;;  %v756_v36 = vmul.f32 %v1441_v26, %v579_v27  ;;  %v764_v37 = vmul.f32 %v1441_v26, %v599_v29 }
  0xcb   : > { %1257 = vst [vmem:[%s1463_s23 + $0x28] sm:$0xff] %v1201_v19   ;;  %v807_v30 = vadd.f32 %v1447_v28, %v771_v24  ;;  %v815_v31 = vadd.f32 %v1447_v28, %v779_v25 }
  0xcc   : > { %v792_v44 = vadd.f32 %v1447_v28, %v756_v36  ;;  %v800_v45 = vadd.f32 %v1447_v28, %v764_v37 }
  0xcd   : > { %v839_v34 = vmax.f32 %v807_v30, 0.0  ;;  %v847_v35 = vmax.f32 %v815_v31, 0.0 }
  0xce   : > { %v824_v52 = vmax.f32 %v792_v44, 0.0  ;;  %v832_v53 = vmax.f32 %v800_v45, 0.0 }
  0xcf   : > { %v1221_v38 = vpack.c.bf16 %v839_v34, %v838_v32  ;;  %v1241_v39 = vpack.c.bf16 %v847_v35, %v846_v33 }
  0xd0   : > { %v619_v40 = vpop.f32.mrf.mxu2  ;;  %v639_v41 = vpop.f32.mrf.mxu3 }
  0xd1   : > { %1261 = vst [vmem:[%s1463_s23 + $0x48] sm:$0xff] %v1221_v38   ;;  %v581_v42 = vpop.f32.mrf.mxu0  ;;  %v601_v43 = vpop.f32.mrf.mxu1  ;;  %v772_v50 = vmul.f32 %v1441_v26, %v619_v40  ;;  %v780_v51 = vmul.f32 %v1441_v26, %v639_v41 }
  0xd2   : > { %1265 = vst [vmem:[%s1463_s23 + $0x68] sm:$0xff] %v1241_v39   ;;  %v757_v46 = vmul.f32 %v1441_v26, %v581_v42  ;;  %v765_v47 = vmul.f32 %v1441_v26, %v601_v43 }
  0xd3   : > { %v808_v60 = vadd.f32 %v1447_v28, %v772_v50  ;;  %v816_v61 = vadd.f32 %v1447_v28, %v780_v51 }
  0xd4   : > { %v793_v48 = vadd.f32 %v1447_v28, %v757_v46  ;;  %v801_v49 = vadd.f32 %v1447_v28, %v765_v47 }
  0xd5   : > { %v840_v4 = vmax.f32 %v808_v60, 0.0  ;;  %v848_v5 = vmax.f32 %v816_v61, 0.0 }
  0xd6   : > { %v825_v54 = vmax.f32 %v793_v48, 0.0  ;;  %v833_v55 = vmax.f32 %v801_v49, 0.0 }
  0xd8   : > { %v1186_v56 = vpack.c.bf16 %v825_v54, %v824_v52  ;;  %v1206_v57 = vpack.c.bf16 %v833_v55, %v832_v53  ;;  %v621_v58 = vpop.f32.mrf.mxu2  ;;  %v641_v59 = vpop.f32.mrf.mxu3 }
  0xd9   : > { %v773_v62 = vmul.f32 %v1441_v26, %v621_v58  ;;  %v781_v63 = vmul.f32 %v1441_v26, %v641_v59  ;;  %v584_v0 = vpop.f32.mrf.mxu0  ;;  %v604_v1 = vpop.f32.mrf.mxu1 }
  0xda   : > { %1254 = vst [vmem:[%s1463_s23 + $0x10] sm:$0xff] %v1186_v56   ;;  %v758_v8 = vmul.f32 %v1441_v26, %v584_v0  ;;  %v766_v9 = vmul.f32 %v1441_v26, %v604_v1 }
  0xdb   : > { %1258 = vst [vmem:[%s1463_s23 + $0x30] sm:$0xff] %v1206_v57   ;;  %v809_v2 = vadd.f32 %v1447_v28, %v773_v62  ;;  %v817_v3 = vadd.f32 %v1447_v28, %v781_v63 }
  0xdc   : > { %v794_v16 = vadd.f32 %v1447_v28, %v758_v8  ;;  %v802_v17 = vadd.f32 %v1447_v28, %v766_v9 }
  0xdd   : > { %v841_v6 = vmax.f32 %v809_v2, 0.0  ;;  %v849_v7 = vmax.f32 %v817_v3, 0.0 }
  0xde   : > { %v826_v24 = vmax.f32 %v794_v16, 0.0  ;;  %v834_v25 = vmax.f32 %v802_v17, 0.0 }
  0xdf   : > { %v1226_v10 = vpack.c.bf16 %v841_v6, %v840_v4  ;;  %v1246_v11 = vpack.c.bf16 %v849_v7, %v848_v5 }
  0xe0   : > { %v624_v12 = vpop.f32.mrf.mxu2  ;;  %v644_v13 = vpop.f32.mrf.mxu3 }
  0xe1   : > { %1262 = vst [vmem:[%s1463_s23 + $0x50] sm:$0xff] %v1226_v10   ;;  %v586_v14 = vpop.f32.mrf.mxu0  ;;  %v606_v15 = vpop.f32.mrf.mxu1  ;;  %v774_v22 = vmul.f32 %v1441_v26, %v624_v12  ;;  %v782_v23 = vmul.f32 %v1441_v26, %v644_v13 }
  0xe2   : > { %1266 = vst [vmem:[%s1463_s23 + $0x70] sm:$0xff] %v1246_v11   ;;  %v759_v18 = vmul.f32 %v1441_v26, %v586_v14  ;;  %v767_v19 = vmul.f32 %v1441_v26, %v606_v15 }
  0xe3   : > { %v810_v34 = vadd.f32 %v1447_v28, %v774_v22  ;;  %v818_v35 = vadd.f32 %v1447_v28, %v782_v23 }
  0xe4   : > { %v795_v20 = vadd.f32 %v1447_v28, %v759_v18  ;;  %v803_v21 = vadd.f32 %v1447_v28, %v767_v19 }
  0xe5   : > { %v842_v40 = vmax.f32 %v810_v34, 0.0  ;;  %v850_v41 = vmax.f32 %v818_v35, 0.0 }
  0xe6   : > { %v827_v27 = vmax.f32 %v795_v20, 0.0  ;;  %v835_v29 = vmax.f32 %v803_v21, 0.0 }
  0xe8   : > { %v1191_v30 = vpack.c.bf16 %v827_v27, %v826_v24  ;;  %v1211_v31 = vpack.c.bf16 %v835_v29, %v834_v25  ;;  %v626_v32 = vpop.f32.mrf.mxu2  ;;  %v646_v33 = vpop.f32.mrf.mxu3 }
  0xe9   : > { %v775_v36 = vmul.f32 %v1441_v26, %v626_v32  ;;  %v783_v37 = vmul.f32 %v1441_v26, %v646_v33 }
  0xea   : > { %1255 = vst [vmem:[%s1463_s23 + $0x18] sm:$0xff] %v1191_v30  }
  0xeb   : > { %1259 = vst [vmem:[%s1463_s23 + $0x38] sm:$0xff] %v1211_v31   ;;  %v811_v38 = vadd.f32 %v1447_v28, %v775_v36  ;;  %v819_v39 = vadd.f32 %v1447_v28, %v783_v37 }
  0xed   : > { %v843_v42 = vmax.f32 %v811_v38, 0.0  ;;  %v851_v43 = vmax.f32 %v819_v39, 0.0 }
  0xef   : > { %v1231_v44 = vpack.c.bf16 %v843_v42, %v842_v40  ;;  %v1251_v45 = vpack.c.bf16 %v851_v43, %v850_v41 }
  0xf1   : > { %1263 = vst [vmem:[%s1463_s23 + $0x58] sm:$0xff] %v1231_v44  }
  0xf2   : > { %1267 = vst [vmem:[%s1463_s23 + $0x78] sm:$0xff] %v1251_v45  }
  0xf3 PF: > { %s14_s17 = sadd.s32 1, %s1340_s17   ;;  %s1549_s15 = smov %s1336_s16 }
  0xf4   : > { %p11_p5 = scmp.ge.s32.totalorder %s14_s17, 4   ;;  %s1550_s16 = smov %s1552_s18 }
  0xf6   :  { %13 = sbr.rel (!%p11_p5) target bundleno = 2 (0x2), region = 83 }

// kernel: resnet_block_forward.5
= control target key start
LH: loop header
LB: loop body
LE: loop exit
PB: predicated region body
PF: predicated region fallthrough
CT: control target
= control target key end

     0   :  { %s2994_s15 = smov 0   ;;  %s2996_s16 = smov 0   ;;  %s3462_s0 = inlined_call_operand.vmem [shape: bf16[2,4,9,9,128], index: 0, kind: input, shape index: {}]   ;;  %s3463_s1 = inlined_call_operand.vmem [shape: bf16[9,128,128], index: 1, kind: input, shape index: {}]   ;;  %s3464_s2 = inlined_call_operand.vmem [shape: f32[1,128], index: 2, kind: input, shape index: {}]   ;;  %s3465_s3 = inlined_call_operand.vmem [shape: f32[1,128], index: 3, kind: input, shape index: {}]   ;;  %s3466_s4 = inlined_call_operand.vmem [shape: bf16[2,8,8,128], index: 4, kind: output, shape index: {}]  }
   0x1   :  { %s2998_s17 = smov 0  }
   0x2 LB: > { %s33_s18 = sadd.s32 1, %s2963_s16  ;;  %p2192_p0 = scmp.ge.s32.totalorder %s2967_s17, 1  ;;  %s2967_s17 = sphi %s2998_s17, %s14_s17   ;;  %s2963_s16 = sphi %s2996_s16, %s3470_s16   ;;  %s2959_s15 = sphi %s2994_s15, %s3469_s15  }
   0x3   : > { %p35_p1 = scmp.ge.s32.totalorder %s33_s18, 2  ;;  %p210_p2 = scmp.lt.s32.totalorder %s2967_s17, 3 }
   0x5   : > { %s3472_s18 = smov (%p35_p1, %s33_s18), 0  ;;  %p211_p3 = pnand %p2192_p0, %p210_p2 }
   0x6   : > { %p253_p4 = scmp.lt.s32.totalorder (!%p211_p3), %s2959_s15, 1 }
   0x7   : > { %214 = sbr.rel (%p211_p3) target bundleno = 339 (0x153), region = 36 }
   0xc   : > { %v2794_v0 = vld [vmem:[%s3463_s1 + $0x38] sm:$0xff]  ;;  %v2793_v2 = vld [vmem:[%s3463_s1 + $0x30] sm:$0xff]  ;;  %s3474_s15 = smov (!%p253_p4, %s2959_s15), 1  ;;  %v2792_v6 = vld [vmem:[%s3463_s1 + $0x28] sm:$0xff]  ;;  %vm587_vm0 = vsmask.f32 3328 }
   0xd   : > { %v2814_v1 = vld [vmem:[%s3463_s1 + $0xb8] sm:$0xff]  ;;  %2902 = vmatpush.bf16.msra.mxu1 %v2794_v0  ;;  %381 = vmatpush.bf16.msra.mxu0 %v2794_v0  ;;  %v2813_v3 = vld [vmem:[%s3463_s1 + $0xb0] sm:$0xff]  ;;  %s2918_s29 = smul.u32 288, %s3474_s15  ;;  %v2812_v7 = vld [vmem:[%s3463_s1 + $0xa8] sm:$0xff]  ;;  %vm588_vm1 = vsmask.f32 7440 }
   0xe   : > { %783 = vmatpush.bf16.msra.mxu2 %v2814_v1  ;;  %v2826_v4 = vld [vmem:[%s3463_s1 + $0xf8] sm:$0xff]  ;;  %v2825_v5 = vld [vmem:[%s3463_s1 + $0xf0] sm:$0xff]  ;;  %v2824_v8 = vld [vmem:[%s3463_s1 + $0xe8] sm:$0xff]  ;;  %s2782_s22 = sshll.u32 %s3474_s15, 5 }
   0xf   : > { %936 = vmatpush.bf16.msra.mxu3 %v2826_v4  ;;  %s3039_s10 = scalar_lea.vmem %s3462_s0, %s2918_s29  ;;  %v2791_v10 = vld [vmem:[%s3463_s1 + $0x20] sm:$0xff]  ;;  %v2790_v23 = vld [vmem:[%s3463_s1 + $0x18] sm:$0xff]  ;;  %v2789_v31 = vld [vmem:[%s3463_s1 + $0x10] sm:$0xff]  ;;  %s3426_s25 = scalar_lea.vmem %s3466_s4, %s2782_s22 }
  0x10   : > { %v571_v9 = vld [vmem:[%s3039_s10] sm:$0xf]  ;;  %v573_v11 = vld [vmem:[%s3039_s10 + $0x8] sm:$0xf]  ;;  %v572_v16 = vld [vmem:[%s3039_s10 + $0x4] sm:$0x1] }
  0x11   : > { %2903 = vmatpush.bf16.msra.mxu1 %v2793_v2  ;;  %382 = vmatpush.bf16.msra.mxu0 %v2793_v2  ;;  %v2811_v12 = vld [vmem:[%s3463_s1 + $0xa0] sm:$0xff]  ;;  %v591_v13 = vshrl.u32 %v571_v9, 16  ;;  %v594_v14 = vshll.u32 %v571_v9, 16  ;;  %v605_v15 = vshrl.u32 %v573_v11, 16  ;;  %v574_v17 = vld [vmem:[%s3039_s10 + $0xc] sm:$0x1]  ;;  %vm3076_vm2 = vmor %vm587_vm0, %vm588_vm1 }
  0x12   : > { %784 = vmatpush.bf16.msra.mxu2 %v2813_v3  ;;  %v608_v18 = vshll.u32 %v573_v11, 16  ;;  %v2823_v19 = vld [vmem:[%s3463_s1 + $0xe0] sm:$0xff]  ;;  %v2810_v25 = vld [vmem:[%s3463_s1 + $0x98] sm:$0xff]  ;;  %v600_v27 = vshll.u32 %v572_v16, 16  ;;  %v614_v28 = vshll.u32 %v574_v17, 16  ;;  %v2809_v32 = vld [vmem:[%s3463_s1 + $0x90] sm:$0xff] }
  0x13   : > { %937 = vmatpush.bf16.msra.mxu3 %v2825_v5  ;;  %v593_v20 = vrot.slane %v591_v13, 4  ;;  %v596_v21 = vrot.slane %v594_v14, 5  ;;  %v607_v22 = vrot.slane %v605_v15, 4  ;;  %v2822_v30 = vld [vmem:[%s3463_s1 + $0xd8] sm:$0xff]  ;;  %v575_v37 = vld [vmem:[%s3039_s10 + $0x10] sm:$0xf] }
  0x14   : > { %v610_v24 = vrot.slane %v608_v18, 5  ;;  %v602_v34 = vrot.slane %v600_v27, 5  ;;  %v616_v36 = vrot.slane %v614_v28, 5  ;;  %v577_v39 = vld [vmem:[%s3039_s10 + $0x18] sm:$0xf]  ;;  %v2821_v40 = vld [vmem:[%s3463_s1 + $0xd0] sm:$0xff] }
  0x15   : > { %2904 = vmatpush.bf16.msra.mxu1 %v2792_v6  ;;  %383 = vmatpush.bf16.msra.mxu0 %v2792_v6  ;;  %v597_v26 = vor.u32 %v596_v21, %v593_v20  ;;  %v2788_v41 = vld [vmem:[%s3463_s1 + $0x8] sm:$0xff]  ;;  %v619_v42 = vshrl.u32 %v575_v37, 16  ;;  %v622_v43 = vshll.u32 %v575_v37, 16  ;;  %v633_v47 = vshrl.u32 %v577_v39, 16  ;;  %v2787_v49 = vld [vmem:[%s3463_s1] sm:$0xff]  ;;  %v2806_v52 = vld [vmem:[%s3463_s1 + $0x78] sm:$0xff] }
  0x16   : > { %785 = vmatpush.bf16.msra.mxu2 %v2812_v7  ;;  %v611_v29 = vor.u32 %v610_v24, %v607_v22  ;;  %v2808_v44 = vld [vmem:[%s3463_s1 + $0x88] sm:$0xff]  ;;  %v636_v48 = vshll.u32 %v577_v39, 16  ;;  %v2206_v50 = vld [vmem:[%s3039_s10 + $0x20] sm:$0xf]  ;;  %v576_v59 = vld [vmem:[%s3039_s10 + $0x14] sm:$0x1] }
  0x17   : > { %938 = vmatpush.bf16.msra.mxu3 %v2824_v8  ;;  %v598_v33 = vrot.slane %v597_v26, 4  ;;  %v2785_v51 = vld [vmem:[%s3039_s10 + $0x24] sm:$0xf0]  ;;  %v2807_v54 = vld [vmem:[%s3463_s1 + $0x80] sm:$0xff]  ;;  %v621_v60 = vrot.slane %v619_v42, 4  ;;  %v624_v61 = vrot.slane %v622_v43, 5 }
  0x18   : > { %v612_v35 = vrot.slane %v611_v29, 4  ;;  %v2820_v53 = vld [vmem:[%s3463_s1 + $0xc8] sm:$0xff]  ;;  %v2198_v55 = vld [vmem:[%s3039_s10] sm:$0xf]  ;;  %v635_v62 = vrot.slane %v633_v47, 4  ;;  %v638_v63 = vrot.slane %v636_v48, 5  ;;  %v2207_v3 = vor.u32 %v2785_v51, %v2206_v50 }
  0x19   : > { %2905 = vmatpush.bf16.msra.mxu1 %v2791_v10  ;;  %384 = vmatpush.bf16.msra.mxu0 %v2791_v10  ;;  %v603_v45 = vsel %vm3076_vm2, %v598_v33, %v602_v34  ;;  %v2783_v56 = vld [vmem:[%s3039_s10 + $0x4] sm:$0xf0]  ;;  %v2838_v0 = vld [vmem:[%s3463_s1 + $0x138] sm:$0xff]  ;;  %v2819_v6 = vld [vmem:[%s3463_s1 + $0xc0] sm:$0xff]  ;;  %v628_v9 = vshll.u32 %v576_v59, 16  ;;  %v625_v11 = vor.u32 %v624_v61, %v621_v60 }
  0x1a   : > { %786 = vmatpush.bf16.msra.mxu2 %v2811_v12  ;;  %v617_v46 = vsel %vm3076_vm2, %v612_v35, %v616_v36  ;;  %v719_v57 = vunpack.c.l.b16 %v603_v45  ;;  %v2858_v1 = vld [vmem:[%s3463_s1 + $0x1b8] sm:$0xff]  ;;  %v2199_v4 = vor.u32 %v2783_v56, %v2198_v55  ;;  %v2390_v7 = vld [vmem:[%s3039_s10 + $0x90] sm:$0xf]  ;;  %v639_v12 = vor.u32 %v638_v63, %v635_v62  ;;  %v2804_v18 = vld [vmem:[%s3463_s1 + $0x68] sm:$0xff] }
  0x1b   : > { %939 = vmatpush.bf16.msra.mxu3 %v2823_v19  ;;  %v720_v58 = vunpack.c.l.b16 %v617_v46  ;;  %v578_v2 = vld [vmem:[%s3039_s10 + $0x1c] sm:$0x1]  ;;  %v2815_v8 = vld [vmem:[%s3039_s10 + $0x94] sm:$0xf0]  ;;  %v2805_v10 = vld [vmem:[%s3463_s1 + $0x70] sm:$0xff]  ;;  %v630_v19 = vrot.slane %v628_v9, 5 }
  0x1c   : > { %v642_v13 = vshll.u32 %v578_v2, 16  ;;  %v2870_v14 = vld [vmem:[%s3463_s1 + $0x1f8] sm:$0xff]  ;;  %v2837_v15 = vld [vmem:[%s3463_s1 + $0x130] sm:$0xff]  ;;  %v2391_v17 = vor.u32 %v2815_v8, %v2390_v7  ;;  %v626_v20 = vrot.slane %v625_v11, 4  ;;  %v640_v21 = vrot.slane %v639_v12, 4  ;;  %v2856_v26 = vld [vmem:[%s3463_s1 + $0x1a8] sm:$0xff] }
  0x1d   : > { %2906 = vmatpush.bf16.msra.mxu1 %v2790_v23  ;;  %385 = vmatpush.bf16.msra.mxu0 %v2790_v23  ;;  %v727_v5 = vpack.c.b16 %v720_v58, %v719_v57  ;;  %v2857_v16 = vld [vmem:[%s3463_s1 + $0x1b0] sm:$0xff]  ;;  %v579_v24 = vld [vmem:[%s3039_s10 + $0x20] sm:$0xf]  ;;  %v581_v27 = vld [vmem:[%s3039_s10 + $0x28] sm:$0xf] }
  0x1e   : > { %787 = vmatpush.bf16.msra.mxu2 %v2810_v25  ;;  %v644_v22 = vrot.slane %v642_v13, 5  ;;  %v2869_v23 = vld [vmem:[%s3463_s1 + $0x1f0] sm:$0xff]  ;;  %v2836_v25 = vld [vmem:[%s3463_s1 + $0x128] sm:$0xff]  ;;  %v647_v28 = vshrl.u32 %v579_v24, 16  ;;  %v650_v29 = vshll.u32 %v579_v24, 16  ;;  %v661_v33 = vshrl.u32 %v581_v27, 16 }
  0x1f   : > { %940 = vmatpush.bf16.msra.mxu3 %v2822_v30  ;;  %v2803_v30 = vld [vmem:[%s3463_s1 + $0x60] sm:$0xff]  ;;  %v664_v34 = vshll.u32 %v581_v27, 16  ;;  %v2868_v35 = vld [vmem:[%s3463_s1 + $0x1e8] sm:$0xff]  ;;  %v2210_v39 = vld [vmem:[%s3039_s10 + $0x30] sm:$0xf] }
  0x20   : > { %v2835_v36 = vld [vmem:[%s3463_s1 + $0x120] sm:$0xff]  ;;  %v2784_v42 = vld [vmem:[%s3039_s10 + $0x14] sm:$0xf0]  ;;  %v649_v45 = vrot.slane %v647_v28, 4  ;;  %v652_v46 = vrot.slane %v650_v29, 5  ;;  %v663_v48 = vrot.slane %v661_v33, 4 }
  0x21   : > { %2907 = vmatpush.bf16.msra.mxu1 %v2789_v31  ;;  %386 = vmatpush.bf16.msra.mxu0 %v2789_v31  ;;  %v631_v31 = vsel %vm3076_vm2, %v626_v20, %v630_v19  ;;  %v2855_v37 = vld [vmem:[%s3463_s1 + $0x1a0] sm:$0xff]  ;;  %v2802_v47 = vld [vmem:[%s3463_s1 + $0x58] sm:$0xff]  ;;  %v2816_v57 = vld [vmem:[%s3039_s10 + $0xa4] sm:$0xf0] }
  0x22   : > { %788 = vmatpush.bf16.msra.mxu2 %v2809_v32  ;;  %v645_v32 = vsel %vm3076_vm2, %v640_v21, %v644_v22  ;;  %v721_v43 = vunpack.c.l.b16 %v631_v31  ;;  %v2834_v50 = vld [vmem:[%s3463_s1 + $0x118] sm:$0xff]  ;;  %v580_v51 = vld [vmem:[%s3039_s10 + $0x24] sm:$0x1]  ;;  %v2394_v56 = vld [vmem:[%s3039_s10 + $0xa0] sm:$0xf]  ;;  %v653_v58 = vor.u32 %v652_v46, %v649_v45 }
  0x23   : > { %941 = vmatpush.bf16.msra.mxu3 %v2821_v40  ;;  %v2786_v40 = vld [vmem:[%s3039_s10 + $0x34] sm:$0xf0]  ;;  %v2801_v59 = vld [vmem:[%s3463_s1 + $0x50] sm:$0xff]  ;;  %v656_v60 = vshll.u32 %v580_v51, 16  ;;  %v2800_v2 = vld [vmem:[%s3463_s1 + $0x48] sm:$0xff] }
  0x24   : > { %v2833_v63 = vld [vmem:[%s3463_s1 + $0x110] sm:$0xff]  ;;  %v2867_v7 = vld [vmem:[%s3463_s1 + $0x1e0] sm:$0xff]  ;;  %v2832_v9 = vld [vmem:[%s3463_s1 + $0x108] sm:$0xff] }
  0x25   : > { %2908 = vmatpush.bf16.msra.mxu1 %v2788_v41  ;;  %387 = vmatpush.bf16.msra.mxu0 %v2788_v41  ;;  %v2202_v41 = vld [vmem:[%s3039_s10 + $0x10] sm:$0xf]  ;;  %v2846_v20 = vld [vmem:[%s3463_s1 + $0x178] sm:$0xff]  ;;  %v2831_v21 = vld [vmem:[%s3463_s1 + $0x100] sm:$0xff] }
  0x26   : > { %789 = vmatpush.bf16.msra.mxu2 %v2808_v44  ;;  %v722_v44 = vunpack.c.l.b16 %v645_v32  ;;  %v583_v8 = vld [vmem:[%s3039_s10 + $0x30] sm:$0xf]  ;;  %v2270_v22 = vld [vmem:[%s3039_s10 + $0x48] sm:$0xf]  ;;  %v2878_v24 = vld [vmem:[%s3463_s1 + $0x238] sm:$0xff] }
  0x27   : > { %942 = vmatpush.bf16.msra.mxu3 %v2820_v53  ;;  %v2211_v53 = vor.u32 %v2786_v40, %v2210_v39  ;;  %v2853_v11 = vld [vmem:[%s3463_s1 + $0x190] sm:$0xff]  ;;  %v675_v12 = vshrl.u32 %v583_v8, 16  ;;  %v678_v13 = vshll.u32 %v583_v8, 16 }
  0x28   : > { %v728_v55 = vpack.c.b16 %v722_v44, %v721_v43  ;;  %v2845_v33 = vld [vmem:[%s3463_s1 + $0x170] sm:$0xff] }
  0x29   : > { %2909 = vmatpush.bf16.msra.mxu1 %v2787_v49  ;;  %388 = vmatpush.bf16.msra.mxu0 %v2787_v49  ;;  %v666_v49 = vrot.slane %v664_v34, 5  ;;  %v677_v29 = vrot.slane %v675_v12, 4  ;;  %v584_v34 = vld [vmem:[%s3039_s10 + $0x34] sm:$0x1]  ;;  %v2398_v40 = vld [vmem:[%s3039_s10 + $0xb0] sm:$0xf] }
  0x2a   : > { %790 = vmatpush.bf16.msra.mxu2 %v2807_v54  ;;  %v2203_v54 = vor.u32 %v2784_v42, %v2202_v41  ;;  %v2817_v41 = vld [vmem:[%s3039_s10 + $0xb4] sm:$0xf0]  ;;  %v2877_v43 = vld [vmem:[%s3463_s1 + $0x230] sm:$0xff]  ;;  %v684_v44 = vshll.u32 %v584_v34, 16  ;;  %v2840_v12 = vld [vmem:[%s3463_s1 + $0x148] sm:$0xff] }
  0x2b   : > { %943 = vmatpush.bf16.msra.mxu3 %v2819_v6  ;;  %v667_v61 = vor.u32 %v666_v49, %v663_v48  ;;  %v2852_v48 = vld [vmem:[%s3463_s1 + $0x188] sm:$0xff]  ;;  %v2399_v49 = vor.u32 %v2817_v41, %v2398_v40  ;;  %v2718_v34 = vld [vmem:[%s3039_s10 + $0x10] sm:$0xf] }
  0x2c   : > { %399 = vmatmul.bf16.vlgmr.msra.gmra.mxu1 %v2207_v3  ;;  %389 = vmatmul.bf16.vlgmr.msra.gmra.mxu0 %v2199_v4  ;;  %v654_v3 = vrot.slane %v653_v58, 4  ;;  %v658_v4 = vrot.slane %v656_v60, 5  ;;  %v686_v51 = vrot.slane %v684_v44, 5  ;;  %v2864_v58 = vld [vmem:[%s3463_s1 + $0x1c8] sm:$0xff]  ;;  %v2282_v44 = vld [vmem:[%s3039_s10 + $0x78] sm:$0xf] }
  0x2d   : > { %518 = vmatpush.bf16.msrb.mxu1 %v2806_v52  ;;  %1089 = vmatpush.bf16.msrb.mxu0 %v2838_v0  ;;  %v582_v52 = vld [vmem:[%s3039_s10 + $0x2c] sm:$0x1]  ;;  %v2395_v0 = vor.u32 %v2816_v57, %v2394_v56  ;;  %v2843_v57 = vld [vmem:[%s3463_s1 + $0x160] sm:$0xff] }
  0x2e   : > { %1505 = vmatpush.bf16.msrb.mxu2 %v2858_v1  ;;  %944 = vmatmul.bf16.vlgmr.msra.gmra.mxu3 %v2391_v17  ;;  %v670_v62 = vshll.u32 %v582_v52, 16  ;;  %v2854_v1 = vld [vmem:[%s3463_s1 + $0x198] sm:$0xff]  ;;  %v2876_v56 = vld [vmem:[%s3463_s1 + $0x228] sm:$0xff] }
  0x2f   : > { %791 = vmatmul.bf16.vlgmr.msra.gmra.mxu2 %v727_v5  ;;  %1658 = vmatpush.bf16.msrb.mxu3 %v2870_v14  ;;  %v668_v5 = vrot.slane %v667_v61, 4  ;;  %v2866_v14 = vld [vmem:[%s3463_s1 + $0x1d8] sm:$0xff] }
  0x30   : > { %v672_v6 = vrot.slane %v670_v62, 5  ;;  %v2842_v62 = vld [vmem:[%s3463_s1 + $0x158] sm:$0xff] }
  0x31   : > { %519 = vmatpush.bf16.msrb.mxu1 %v2805_v10  ;;  %1090 = vmatpush.bf16.msrb.mxu0 %v2837_v15  ;;  %v585_v10 = vld [vmem:[%s3039_s10 + $0x38] sm:$0xf]  ;;  %v2799_v15 = vld [vmem:[%s3463_s1 + $0x40] sm:$0xff] }
  0x32   : > { %1506 = vmatpush.bf16.msrb.mxu2 %v2857_v16  ;;  %v659_v16 = vsel %vm3076_vm2, %v654_v3, %v658_v4  ;;  %v673_v17 = vsel %vm3076_vm2, %v668_v5, %v672_v6  ;;  %v692_v19 = vshll.u32 %v585_v10, 16  ;;  %v2841_v5 = vld [vmem:[%s3463_s1 + $0x150] sm:$0xff] }
  0x33   : > { %1659 = vmatpush.bf16.msrb.mxu3 %v2869_v23  ;;  %v2795_v23 = vld [vmem:[%s3039_s10 + $0x4c] sm:$0xf0]  ;;  %v723_v27 = vunpack.c.l.b16 %v659_v16  ;;  %v724_v28 = vunpack.c.l.b16 %v673_v17  ;;  %v2278_v17 = vld [vmem:[%s3039_s10 + $0x68] sm:$0xf] }
  0x34   : > { %v694_v32 = vrot.slane %v692_v19, 5  ;;  %v2873_v16 = vld [vmem:[%s3463_s1 + $0x210] sm:$0xff] }
  0x35   : > { %520 = vmatpush.bf16.msrb.mxu1 %v2804_v18  ;;  %1091 = vmatpush.bf16.msrb.mxu0 %v2836_v25  ;;  %v689_v18 = vshrl.u32 %v585_v10, 16  ;;  %v2462_v25 = vld [vmem:[%s3039_s10 + $0xd8] sm:$0xf]  ;;  %v729_v39 = vpack.c.b16 %v724_v28, %v723_v27  ;;  %v2818_v10 = vld [vmem:[%s3039_s10 + $0xc4] sm:$0xf0] }
  0x36   : > { %1507 = vmatpush.bf16.msrb.mxu2 %v2856_v26  ;;  %v2827_v26 = vld [vmem:[%s3039_s10 + $0xdc] sm:$0xf0]  ;;  %v2797_v19 = vld [vmem:[%s3039_s10 + $0x6c] sm:$0xf0]  ;;  %v2859_v28 = vld [vmem:[%s3039_s10 + $0x54] sm:$0xf0] }
  0x37   : > { %1660 = vmatpush.bf16.msrb.mxu3 %v2868_v35  ;;  %v691_v31 = vrot.slane %v689_v18, 4  ;;  %v586_v35 = vld [vmem:[%s3039_s10 + $0x3c] sm:$0x1]  ;;  %v2872_v18 = vld [vmem:[%s3463_s1 + $0x208] sm:$0xff]  ;;  %v2670_v27 = vld [vmem:[%s3039_s10 + $0x50] sm:$0xf] }
  0x38   : > { %v698_v46 = vshll.u32 %v586_v35, 16 }
  0x39   : > { %521 = vmatpush.bf16.msrb.mxu1 %v2803_v30  ;;  %1092 = vmatpush.bf16.msrb.mxu0 %v2835_v36  ;;  %v680_v30 = vrot.slane %v678_v13, 5  ;;  %v2271_v36 = vor.u32 %v2795_v23, %v2270_v22  ;;  %v695_v45 = vor.u32 %v694_v32, %v691_v31  ;;  %v2863_v13 = vld [vmem:[%s3463_s1 + $0x1c0] sm:$0xff]  ;;  %v2598_v22 = vld [vmem:[%s3039_s10 + $0x8] sm:$0xf]  ;;  %v2847_v23 = vld [vmem:[%s3039_s10 + $0xc] sm:$0xf0] }
  0x3a   : > { %1508 = vmatpush.bf16.msrb.mxu2 %v2855_v37  ;;  %v2463_v37 = vor.u32 %v2827_v26, %v2462_v25  ;;  %v2599_v26 = vor.u32 %v2847_v23, %v2598_v22  ;;  %v2508_v31 = vld [vmem:[%s3039_s10 + $0x90] sm:$0xf]  ;;  %v2510_v32 = vld [vmem:[%s3039_s10 + $0x98] sm:$0xf] }
  0x3b   : > { %1661 = vmatpush.bf16.msrb.mxu3 %v2867_v7  ;;  %v681_v42 = vor.u32 %v680_v30, %v677_v29  ;;  %v696_v52 = vrot.slane %v695_v45, 4  ;;  %v2671_v29 = vor.u32 %v2859_v28, %v2670_v27  ;;  %v2871_v30 = vld [vmem:[%s3463_s1 + $0x200] sm:$0xff]  ;;  %v1159_v35 = vshrl.u32 %v2508_v31, 16 }
  0x3c   : > { %404 = vmatmul.bf16.gmra.mxu1 %v2211_v53  ;;  %394 = vmatmul.bf16.gmra.mxu0 %v2203_v54  ;;  %v700_v53 = vrot.slane %v698_v46, 5  ;;  %v2851_v54 = vld [vmem:[%s3463_s1 + $0x180] sm:$0xff]  ;;  %v2474_v46 = vld [vmem:[%s3039_s10 + $0x108] sm:$0xf] }
  0x3d   : > { %522 = vmatpush.bf16.msrb.mxu1 %v2802_v47  ;;  %1093 = vmatpush.bf16.msrb.mxu0 %v2834_v50  ;;  %v2844_v47 = vld [vmem:[%s3463_s1 + $0x168] sm:$0xff]  ;;  %v682_v50 = vrot.slane %v681_v42, 4  ;;  %v1742_v42 = vshrl.u32 %v2718_v34, 16  ;;  %v2798_v45 = vld [vmem:[%s3039_s10 + $0x7c] sm:$0xf0] }
  0x3e   : > { %1509 = vmatpush.bf16.msrb.mxu2 %v2854_v1  ;;  %949 = vmatmul.bf16.gmra.mxu3 %v2395_v0  ;;  %v701_v61 = vsel %vm3076_vm2, %v696_v52, %v700_v53  ;;  %v2796_v0 = vld [vmem:[%s3039_s10 + $0x5c] sm:$0xf0]  ;;  %v2466_v1 = vld [vmem:[%s3039_s10 + $0xe8] sm:$0xf] }
  0x3f   : > { %796 = vmatmul.bf16.gmra.mxu2 %v728_v55  ;;  %1662 = vmatpush.bf16.msrb.mxu3 %v2866_v14  ;;  %v2865_v55 = vld [vmem:[%s3463_s1 + $0x1d0] sm:$0xff]  ;;  %v687_v60 = vsel %vm3076_vm2, %v682_v50, %v686_v51  ;;  %v726_v4 = vunpack.c.l.b16 %v701_v61  ;;  %v2874_v14 = vld [vmem:[%s3463_s1 + $0x218] sm:$0xff]  ;;  %v1161_v51 = vrot.slane %v1159_v35, 4 }
  0x40   : > { %v725_v3 = vunpack.c.l.b16 %v687_v60  ;;  %v2511_v50 = vld [vmem:[%s3039_s10 + $0x9c] sm:$0x1]  ;;  %v2717_v60 = vld [vmem:[%s3039_s10 + $0xc] sm:$0x1]  ;;  %v2719_v61 = vld [vmem:[%s3039_s10 + $0x14] sm:$0x1] }
  0x41   : > { %523 = vmatpush.bf16.msrb.mxu1 %v2801_v59  ;;  %1094 = vmatpush.bf16.msrb.mxu0 %v2833_v63  ;;  %v2875_v59 = vld [vmem:[%s3463_s1 + $0x220] sm:$0xff]  ;;  %v2274_v63 = vld [vmem:[%s3039_s10 + $0x58] sm:$0xf] }
  0x42   : > { %1510 = vmatpush.bf16.msrb.mxu2 %v2853_v11  ;;  %v2275_v6 = vor.u32 %v2796_v0, %v2274_v63  ;;  %v730_v8 = vpack.c.b16 %v726_v4, %v725_v3  ;;  %v1182_v0 = vshll.u32 %v2511_v50, 16 }
  0x43   : > { %1663 = vmatpush.bf16.msrb.mxu3 %v2865_v55  ;;  %v2848_v55 = vld [vmem:[%s3039_s10 + $0x1c] sm:$0xf0] }
  0x45   : > { %524 = vmatpush.bf16.msrb.mxu1 %v2800_v2  ;;  %1095 = vmatpush.bf16.msrb.mxu0 %v2832_v9  ;;  %v2828_v2 = vld [vmem:[%s3039_s10 + $0xec] sm:$0xf0]  ;;  %v2402_v9 = vld [vmem:[%s3039_s10 + $0xc0] sm:$0xf] }
  0x46   : > { %1511 = vmatpush.bf16.msrb.mxu2 %v2852_v48  ;;  %v2467_v7 = vor.u32 %v2828_v2, %v2466_v1  ;;  %v2403_v11 = vor.u32 %v2818_v10, %v2402_v9  ;;  %v2602_v48 = vld [vmem:[%s3039_s10 + $0x18] sm:$0xf]  ;;  %v1751_v10 = vshll.u32 %v2719_v61, 16 }
  0x47   : > { %1664 = vmatpush.bf16.msrb.mxu3 %v2864_v58  ;;  %v1744_v58 = vrot.slane %v1742_v42, 4  ;;  %v2603_v2 = vor.u32 %v2848_v55, %v2602_v48  ;;  %v2515_v42 = vld [vmem:[%s3039_s10 + $0xac] sm:$0x1] }
  0x48   : > { %v1753_v23 = vrot.slane %v1751_v10, 5 }
  0x49   : > { %525 = vmatpush.bf16.msrb.mxu1 %v2799_v15  ;;  %1096 = vmatpush.bf16.msrb.mxu0 %v2831_v21  ;;  %v2839_v15 = vld [vmem:[%s3463_s1 + $0x140] sm:$0xff] }
  0x4a   : > { %1512 = vmatpush.bf16.msrb.mxu2 %v2851_v54  ;;  %v2829_v21 = vld [vmem:[%s3039_s10 + $0xfc] sm:$0xf0] }
  0x4b   : > { %1665 = vmatpush.bf16.msrb.mxu3 %v2863_v13  ;;  %v2512_v13 = vld [vmem:[%s3039_s10 + $0xa0] sm:$0xf] }
  0x4c   : > { %526 = vmatmul.bf16.vlgmr.msrb.gmra.mxu1 %v2271_v36  ;;  %1097 = vmatmul.bf16.vlgmr.msrb.gmra.mxu0 %v2463_v37  ;;  %v1162_v36 = vshll.u32 %v2508_v31, 16  ;;  %v1173_v37 = vshrl.u32 %v2510_v32, 16 }
  0x4d   : > { %1351 = vmatpush.bf16.msra.mxu1 %v2846_v20  ;;  %1920 = vmatpush.bf16.msra.mxu0 %v2878_v24  ;;  %v2470_v20 = vld [vmem:[%s3039_s10 + $0xf8] sm:$0xf] }
  0x4e   : > { %954 = vmatmul.bf16.gmra.mxu3 %v2399_v49  ;;  %2910 = vmatpush.bf16.msra.mxu2 %v2878_v24  ;;  %v2279_v24 = vor.u32 %v2797_v19, %v2278_v17  ;;  %v2471_v25 = vor.u32 %v2829_v21, %v2470_v20  ;;  %v2509_v49 = vld [vmem:[%s3039_s10 + $0x94] sm:$0x1]  ;;  %v1164_v52 = vrot.slane %v1162_v36, 5  ;;  %v1175_v53 = vrot.slane %v1173_v37, 4  ;;  %v2722_v19 = vld [vmem:[%s3039_s10 + $0x20] sm:$0xf] }
  0x4f   : > { %801 = vmatmul.bf16.gmra.mxu2 %v729_v39  ;;  %v1176_v39 = vshll.u32 %v2510_v32, 16  ;;  %v1168_v63 = vshll.u32 %v2509_v49, 16  ;;  %v1773_v31 = vshll.u32 %v2722_v19, 16  ;;  %v2513_v36 = vld [vmem:[%s3039_s10 + $0xa4] sm:$0x1] }
  0x50   : > { %v1165_v3 = vor.u32 %v1164_v52, %v1161_v51  ;;  %v2721_v51 = vld [vmem:[%s3039_s10 + $0x1c] sm:$0x1]  ;;  %v2723_v52 = vld [vmem:[%s3039_s10 + $0x24] sm:$0x1] }
  0x51   : > { %1352 = vmatpush.bf16.msra.mxu1 %v2845_v33  ;;  %1921 = vmatpush.bf16.msra.mxu0 %v2877_v43  ;;  %v2716_v33 = vld [vmem:[%s3039_s10 + $0x8] sm:$0xf]  ;;  %v1178_v54 = vrot.slane %v1176_v39, 5 }
  0x52   : > { %2911 = vmatpush.bf16.msra.mxu2 %v2877_v43  ;;  %v1728_v40 = vshrl.u32 %v2716_v33, 16  ;;  %v1731_v41 = vshll.u32 %v2716_v33, 16  ;;  %v1745_v43 = vshll.u32 %v2718_v34, 16 }
  0x53   : > { %v1179_v4 = vor.u32 %v1178_v54, %v1175_v53  ;;  %v2606_v53 = vld [vmem:[%s3039_s10 + $0x28] sm:$0xf]  ;;  %v2849_v54 = vld [vmem:[%s3039_s10 + $0x2c] sm:$0xf0] }
  0x55   : > { %1353 = vmatpush.bf16.msra.mxu1 %v2844_v47  ;;  %1922 = vmatpush.bf16.msra.mxu0 %v2876_v56  ;;  %v2830_v47 = vld [vmem:[%s3039_s10 + $0x10c] sm:$0xf0] }
  0x56   : > { %2912 = vmatpush.bf16.msra.mxu2 %v2876_v56  ;;  %v1730_v56 = vrot.slane %v1728_v40, 4  ;;  %v2475_v1 = vor.u32 %v2830_v47, %v2474_v46  ;;  %v1775_v46 = vrot.slane %v1773_v31, 5 }
  0x59   : > { %1354 = vmatpush.bf16.msra.mxu1 %v2843_v57  ;;  %1923 = vmatpush.bf16.msra.mxu0 %v2875_v59  ;;  %v1733_v57 = vrot.slane %v1731_v41, 5 }
  0x5a   : > { %2913 = vmatpush.bf16.msra.mxu2 %v2875_v59  ;;  %v1747_v59 = vrot.slane %v1745_v43, 5 }
  0x5c   : > { %531 = vmatmul.bf16.gmra.mxu1 %v2275_v6  ;;  %1102 = vmatmul.bf16.gmra.mxu0 %v2467_v7  ;;  %v2860_v6 = vld [vmem:[%s3039_s10 + $0x64] sm:$0xf0]  ;;  %v1734_v7 = vor.u32 %v1733_v57, %v1730_v56  ;;  %v1748_v9 = vor.u32 %v1747_v59, %v1744_v58  ;;  %v1196_v56 = vshll.u32 %v2513_v36, 16  ;;  %v1210_v58 = vshll.u32 %v2515_v42, 16  ;;  %v2517_v42 = vld [vmem:[%s3039_s10 + $0xb4] sm:$0x1] }
  0x5d   : > { %1355 = vmatpush.bf16.msra.mxu1 %v2842_v62  ;;  %1924 = vmatpush.bf16.msra.mxu0 %v2874_v14  ;;  %v2283_v62 = vor.u32 %v2798_v45, %v2282_v44 }
  0x5e   : > { %959 = vmatmul.bf16.gmra.mxu3 %v2403_v11  ;;  %2914 = vmatpush.bf16.msra.mxu2 %v2874_v14  ;;  %v1170_v11 = vrot.slane %v1168_v63, 5  ;;  %v2514_v14 = vld [vmem:[%s3039_s10 + $0xa8] sm:$0xf]  ;;  %v1735_v20 = vrot.slane %v1734_v7, 4  ;;  %v1749_v22 = vrot.slane %v1748_v9, 4  ;;  %v1212_v7 = vrot.slane %v1210_v58, 5 }
  0x5f   : > { %806 = vmatmul.bf16.gmra.mxu2 %v730_v8  ;;  %v1737_v8 = vshll.u32 %v2717_v60, 16  ;;  %v1204_v27 = vshll.u32 %v2514_v14, 16  ;;  %v1765_v60 = vshll.u32 %v2721_v51, 16  ;;  %v2610_v51 = vld [vmem:[%s3039_s10 + $0x38] sm:$0xf] }
  0x60   : > { %v1754_v35 = vsel %vm3076_vm2, %v1749_v22, %v1753_v23  ;;  %v2729_v58 = vld [vmem:[%s3039_s10 + $0x3c] sm:$0x1] }
  0x61   : > { %1356 = vmatpush.bf16.msra.mxu1 %v2841_v5  ;;  %1925 = vmatpush.bf16.msra.mxu0 %v2873_v16  ;;  %v2674_v5 = vld [vmem:[%s3039_s10 + $0x60] sm:$0xf]  ;;  %v1739_v21 = vrot.slane %v1737_v8, 5  ;;  %v1206_v41 = vrot.slane %v1204_v27, 5  ;;  %v1857_v50 = vunpack.c.l.b16 %v1754_v35  ;;  %v1767_v9 = vrot.slane %v1765_v60, 5 }
  0x62   : > { %2915 = vmatpush.bf16.msra.mxu2 %v2873_v16  ;;  %v1180_v16 = vrot.slane %v1179_v4, 4  ;;  %v2675_v17 = vor.u32 %v2860_v6, %v2674_v5  ;;  %v1198_v5 = vrot.slane %v1196_v56, 5  ;;  %v2850_v56 = vld [vmem:[%s3039_s10 + $0x3c] sm:$0xf0] }
  0x63   : > { %v1740_v34 = vsel %vm3076_vm2, %v1735_v20, %v1739_v21  ;;  %v2728_v21 = vld [vmem:[%s3039_s10 + $0x38] sm:$0xf] }
  0x64   : > { %v1856_v49 = vunpack.c.l.b16 %v1740_v34  ;;  %v1815_v34 = vshll.u32 %v2728_v21, 16 }
  0x65   : > { %1357 = vmatpush.bf16.msra.mxu1 %v2840_v12  ;;  %1926 = vmatpush.bf16.msra.mxu0 %v2872_v18  ;;  %v1184_v12 = vrot.slane %v1182_v0, 5 }
  0x66   : > { %2916 = vmatpush.bf16.msra.mxu2 %v2872_v18  ;;  %v2720_v18 = vld [vmem:[%s3039_s10 + $0x18] sm:$0xf]  ;;  %v1864_v0 = vpack.c.b16 %v1857_v50, %v1856_v49 }
  0x67   : > { %v1756_v28 = vshrl.u32 %v2720_v18, 16  ;;  %v1185_v33 = vsel %vm3076_vm2, %v1180_v16, %v1184_v12  ;;  %v2516_v12 = vld [vmem:[%s3039_s10 + $0xb0] sm:$0xf] }
  0x68   : > { %v1288_v48 = vunpack.c.l.b16 %v1185_v33  ;;  %v2726_v16 = vld [vmem:[%s3039_s10 + $0x30] sm:$0xf]  ;;  %v1218_v20 = vshll.u32 %v2516_v12, 16  ;;  %v1812_v33 = vshrl.u32 %v2728_v21, 16 }
  0x69   : > { %1358 = vmatpush.bf16.msra.mxu1 %v2839_v15  ;;  %1927 = vmatpush.bf16.msra.mxu0 %v2871_v30  ;;  %v1166_v15 = vrot.slane %v1165_v3, 4  ;;  %v1758_v43 = vrot.slane %v1756_v28, 4  ;;  %v2861_v3 = vld [vmem:[%s3039_s10 + $0x74] sm:$0xf0] }
  0x6a   : > { %2917 = vmatpush.bf16.msra.mxu2 %v2871_v30  ;;  %v1770_v30 = vshrl.u32 %v2722_v19, 16  ;;  %v1215_v19 = vshrl.u32 %v2516_v12, 16  ;;  %v1220_v36 = vrot.slane %v1218_v20, 5 }
  0x6b   : > { %v1171_v32 = vsel %vm3076_vm2, %v1166_v15, %v1170_v11  ;;  %v2724_v15 = vld [vmem:[%s3039_s10 + $0x28] sm:$0xf] }
  0x6c   : > { %536 = vmatmul.bf16.gmra.mxu1 %v2279_v24  ;;  %1107 = vmatmul.bf16.gmra.mxu0 %v2471_v25  ;;  %v1187_v24 = vshrl.u32 %v2512_v13, 16  ;;  %v1190_v25 = vshll.u32 %v2512_v13, 16  ;;  %v1772_v45 = vrot.slane %v1770_v30, 4  ;;  %v1287_v47 = vunpack.c.l.b16 %v1171_v32 }
  0x6d   : > { %v1784_v27 = vshrl.u32 %v2724_v15, 16  ;;  %v1787_v28 = vshll.u32 %v2724_v15, 16  ;;  %v1801_v30 = vshll.u32 %v2726_v16, 16  ;;  %v1217_v35 = vrot.slane %v1215_v19, 4 }
  0x6e   : > { %1666 = vmatmul.bf16.vlgmr.msrb.gmra.mxu3 %v2671_v29  ;;  %v1759_v29 = vshll.u32 %v2720_v18, 16  ;;  %v1189_v37 = vrot.slane %v1187_v24, 4  ;;  %v1192_v39 = vrot.slane %v1190_v25, 5  ;;  %v1776_v61 = vor.u32 %v1775_v46, %v1772_v45  ;;  %v2725_v46 = vld [vmem:[%s3039_s10 + $0x2c] sm:$0x1] }
  0x6f   : > { %1513 = vmatmul.bf16.vlgmr.msrb.gmra.mxu2 %v2599_v26  ;;  %v1201_v26 = vshrl.u32 %v2514_v14, 16  ;;  %v1295_v63 = vpack.c.b16 %v1288_v48, %v1287_v47  ;;  %v2518_v14 = vld [vmem:[%s3039_s10 + $0xb8] sm:$0xf]  ;;  %v1786_v47 = vrot.slane %v1784_v27, 4  ;;  %v1789_v48 = vrot.slane %v1787_v28, 5 }
  0x70   : > { %v1761_v44 = vrot.slane %v1759_v29, 5  ;;  %v1193_v55 = vor.u32 %v1192_v39, %v1189_v37  ;;  %v1777_v10 = vrot.slane %v1776_v61, 4  ;;  %v1229_v24 = vshrl.u32 %v2518_v14, 16  ;;  %v2522_v27 = vld [vmem:[%s3039_s10 + $0xc8] sm:$0xf] }
  0x71   : > { %v1203_v40 = vrot.slane %v1201_v26, 4  ;;  %v1232_v25 = vshll.u32 %v2518_v14, 16  ;;  %v2730_v26 = vld [vmem:[%s3039_s10 + $0x40] sm:$0xf]  ;;  %v1798_v29 = vshrl.u32 %v2726_v16, 16  ;;  %v1803_v50 = vrot.slane %v1801_v30, 5 }
  0x72   : > { %v1762_v59 = vor.u32 %v1761_v44, %v1758_v43  ;;  %v1194_v4 = vrot.slane %v1193_v55, 4  ;;  %v1826_v37 = vshrl.u32 %v2730_v26, 16  ;;  %v1829_v39 = vshll.u32 %v2730_v26, 16  ;;  %v2519_v43 = vld [vmem:[%s3039_s10 + $0xbc] sm:$0x1] }
  0x73   : > { %v1207_v57 = vor.u32 %v1206_v41, %v1203_v40  ;;  %v1231_v44 = vrot.slane %v1229_v24, 4  ;;  %v1234_v45 = vrot.slane %v1232_v25, 5  ;;  %v1800_v49 = vrot.slane %v1798_v29, 4  ;;  %v2520_v24 = vld [vmem:[%s3039_s10 + $0xc0] sm:$0xf] }
  0x74   : > { %v1763_v8 = vrot.slane %v1762_v59, 4  ;;  %v1828_v59 = vrot.slane %v1826_v37, 4  ;;  %v1831_v60 = vrot.slane %v1829_v39, 5  ;;  %v1224_v61 = vshll.u32 %v2517_v42, 16 }
  0x75   : > { %v1208_v6 = vrot.slane %v1207_v57, 4  ;;  %v1221_v57 = vor.u32 %v1220_v36, %v1217_v35  ;;  %v1257_v35 = vshrl.u32 %v2522_v27, 16  ;;  %v1260_v36 = vshll.u32 %v2522_v27, 16 }
  0x76   : > { %v1768_v22 = vsel %vm3076_vm2, %v1763_v8, %v1767_v9  ;;  %v2862_v8 = vld [vmem:[%s3039_s10 + $0x84] sm:$0xf0]  ;;  %v1832_v12 = vor.u32 %v1831_v60, %v1828_v59  ;;  %v1226_v14 = vrot.slane %v1224_v61, 5 }
  0x77   : > { %v1213_v18 = vsel %vm3076_vm2, %v1208_v6, %v1212_v7  ;;  %v1858_v40 = vunpack.c.l.b16 %v1768_v22  ;;  %v2611_v6 = vor.u32 %v2850_v56, %v2610_v51  ;;  %v2682_v7 = vld [vmem:[%s3039_s10 + $0x80] sm:$0xf] }
  0x78   : > { %v1290_v32 = vunpack.c.l.b16 %v1213_v18  ;;  %v2683_v18 = vor.u32 %v2862_v8, %v2682_v7  ;;  %v1833_v25 = vrot.slane %v1832_v12, 4 }
  0x7c   : > { %541 = vmatmul.bf16.gmra.mxu1 %v2283_v62  ;;  %1112 = vmatmul.bf16.gmra.mxu0 %v2475_v1  ;;  %v1779_v62 = vshll.u32 %v2723_v52, 16  ;;  %v2607_v1 = vor.u32 %v2849_v54, %v2606_v53  ;;  %v2727_v52 = vld [vmem:[%s3039_s10 + $0x34] sm:$0x1]  ;;  %v1814_v53 = vrot.slane %v1812_v33, 4  ;;  %v1817_v54 = vrot.slane %v1815_v34, 5 }
  0x7d   : > { %v1246_v34 = vshll.u32 %v2520_v24, 16 }
  0x7e   : > { %1671 = vmatmul.bf16.gmra.mxu3 %v2675_v17  ;;  %v1781_v11 = vrot.slane %v1779_v62, 5  ;;  %v1199_v17 = vsel %vm3076_vm2, %v1194_v4, %v1198_v5  ;;  %v1235_v62 = vor.u32 %v1234_v45, %v1231_v44  ;;  %v1804_v4 = vor.u32 %v1803_v50, %v1800_v49  ;;  %v2523_v50 = vld [vmem:[%s3039_s10 + $0xcc] sm:$0x1] }
  0x7f   : > { %1518 = vmatmul.bf16.gmra.mxu2 %v2603_v2  ;;  %v2678_v2 = vld [vmem:[%s3039_s10 + $0x70] sm:$0xf]  ;;  %v1289_v31 = vunpack.c.l.b16 %v1199_v17  ;;  %v1807_v5 = vshll.u32 %v2727_v52, 16  ;;  %v1818_v9 = vor.u32 %v1817_v54, %v1814_v53  ;;  %v1262_v49 = vrot.slane %v1260_v36, 5 }
  0x80   : > { %v2679_v13 = vor.u32 %v2861_v3, %v2678_v2  ;;  %v1782_v23 = vsel %vm3076_vm2, %v1777_v10, %v1781_v11  ;;  %v1790_v3 = vor.u32 %v1789_v48, %v1786_v47  ;;  %v1821_v10 = vshll.u32 %v2729_v58, 16 }
  0x81   : > { %v1859_v41 = vunpack.c.l.b16 %v1782_v23  ;;  %v1296_v55 = vpack.c.b16 %v1290_v32, %v1289_v31  ;;  %v1222_v11 = vrot.slane %v1221_v57, 4  ;;  %v1236_v15 = vrot.slane %v1235_v62, 4 }
  0x82   : > { %v1791_v19 = vrot.slane %v1790_v3, 4  ;;  %v1805_v20 = vrot.slane %v1804_v4, 4  ;;  %v1809_v21 = vrot.slane %v1807_v5, 5  ;;  %v1819_v22 = vrot.slane %v1818_v9, 4 }
  0x83   : > { %v1865_v2 = vpack.c.b16 %v1859_v41, %v1858_v40  ;;  %v1823_v23 = vrot.slane %v1821_v10, 5  ;;  %v1227_v28 = vsel %vm3076_vm2, %v1222_v11, %v1226_v14  ;;  %v1243_v32 = vshrl.u32 %v2520_v24, 16 }
  0x84   : > { %v1810_v31 = vsel %vm3076_vm2, %v1805_v20, %v1809_v21  ;;  %v1291_v39 = vunpack.c.l.b16 %v1227_v28  ;;  %v1248_v47 = vrot.slane %v1246_v34, 5  ;;  %v1259_v48 = vrot.slane %v1257_v35, 4 }
  0x85   : > { %v1824_v33 = vsel %vm3076_vm2, %v1819_v22, %v1823_v23  ;;  %v1861_v42 = vunpack.c.l.b16 %v1810_v31  ;;  %v1245_v44 = vrot.slane %v1243_v32, 4  ;;  %v1266_v59 = vshll.u32 %v2523_v50, 16 }
  0x86   : > { %v1263_v58 = vor.u32 %v1262_v49, %v1259_v48 }
  0x87   : > { %v1249_v57 = vor.u32 %v1248_v47, %v1245_v44 }
  0x88   : > { %v1264_v62 = vrot.slane %v1263_v58, 4 }
  0x89   : > { %v1250_v60 = vrot.slane %v1249_v57, 4 }
  0x8c   : > { %1359 = vmatmul.bf16.vlgmr.msra.gmra.mxu1 %v1295_v63  ;;  %1928 = vmatmul.bf16.vlgmr.msra.gmra.mxu0 %v1864_v0  ;;  %v1238_v63 = vshll.u32 %v2519_v43, 16  ;;  %v1793_v0 = vshll.u32 %v2725_v46, 16  ;;  %v1862_v43 = vunpack.c.l.b16 %v1824_v33  ;;  %v2521_v46 = vld [vmem:[%s3039_s10 + $0xc4] sm:$0x1] }
  0x8d   : > { %v1252_v53 = vshll.u32 %v2521_v46, 16 }
  0x8e   : > { %1676 = vmatmul.bf16.gmra.mxu3 %v2679_v13  ;;  %v1240_v16 = vrot.slane %v1238_v63, 5  ;;  %v1795_v17 = vrot.slane %v1793_v0, 5  ;;  %v1268_v63 = vrot.slane %v1266_v59, 5 }
  0x8f   : > { %1523 = vmatmul.bf16.gmra.mxu2 %v2607_v1  ;;  %v2731_v1 = vld [vmem:[%s3039_s10 + $0x44] sm:$0x1]  ;;  %v1254_v61 = vrot.slane %v1252_v53, 5 }
  0x90   : > { %v1835_v13 = vshll.u32 %v2731_v1, 16  ;;  %v1241_v29 = vsel %vm3076_vm2, %v1236_v15, %v1240_v16  ;;  %v1796_v30 = vsel %vm3076_vm2, %v1791_v19, %v1795_v17  ;;  %v1269_v4 = vsel %vm3076_vm2, %v1264_v62, %v1268_v63 }
  0x91   : > { %v1292_v40 = vunpack.c.l.b16 %v1241_v29  ;;  %v1860_v41 = vunpack.c.l.b16 %v1796_v30  ;;  %v1255_v3 = vsel %vm3076_vm2, %v1250_v60, %v1254_v61  ;;  %v1294_v7 = vunpack.c.l.b16 %v1269_v4 }
  0x92   : > { %v1837_v26 = vrot.slane %v1835_v13, 5 }
  0x93   : > { %v1297_v51 = vpack.c.b16 %v1292_v40, %v1291_v39  ;;  %v1866_v52 = vpack.c.b16 %v1861_v42, %v1860_v41 }
  0x94   : > { %v1838_v37 = vsel %vm3076_vm2, %v1833_v25, %v1837_v26 }
  0x95   : > { %v1863_v45 = vunpack.c.l.b16 %v1838_v37 }
  0x97   : > { %v1867_v56 = vpack.c.b16 %v1863_v45, %v1862_v43 }
  0x9c   : > { %1364 = vmatmul.bf16.gmra.mxu1 %v1296_v55  ;;  %1933 = vmatmul.bf16.gmra.mxu0 %v1865_v2 }
  0x9e   : > { %1681 = vmatmul.bf16.gmra.mxu3 %v2683_v18 }
  0x9f   : > { %1528 = vmatmul.bf16.gmra.mxu2 %v2611_v6  ;;  %v1293_v6 = vunpack.c.l.b16 %v1255_v3 }
  0xa1   : > { %v1298_v8 = vpack.c.b16 %v1294_v7, %v1293_v6 }
  0xa9   : > { %v400_v54 = vpop.f32.mrf.mxu1  ;;  %v390_v55 = vpop.f32.mrf.mxu0 }
  0xac   : > { %1369 = vmatmul.bf16.gmra.mxu1 %v1297_v51  ;;  %1938 = vmatmul.bf16.gmra.mxu0 %v1866_v52 }
  0xaf   : > { %1943 = vmatmul.bf16.vlgmr.msra.gmra.mxu2 %v1867_v56 }
  0xb1   : > { %v402_v1 = vpop.f32.mrf.mxu1  ;;  %v392_v2 = vpop.f32.mrf.mxu0 }
  0xb2   : > { %v792_v0 = vpop.f32.mrf.mxu2  ;;  %v945_v5 = vpop.f32.mrf.mxu3 }
  0xb9   : > { %v405_v10 = vpop.f32.mrf.mxu1  ;;  %v395_v11 = vpop.f32.mrf.mxu0 }
  0xba   : > { %v794_v9 = vpop.f32.mrf.mxu2  ;;  %v3384_v12 = vpop.f32.mrf.mxu3 }
  0xbc   : > { %1374 = vmatmul.bf16.gmra.mxu1 %v1298_v8 }
  0xc1   : > { %v407_v14 = vpop.f32.mrf.mxu1  ;;  %v397_v15 = vpop.f32.mrf.mxu0 }
  0xc2   : > { %v797_v13 = vpop.f32.mrf.mxu2  ;;  %v950_v16 = vpop.f32.mrf.mxu3 }
  0xc9   : > { %v527_v18 = vpop.f32.mrf.mxu1  ;;  %v1098_v19 = vpop.f32.mrf.mxu0 }
  0xca   : > { %v799_v17 = vpop.f32.mrf.mxu2  ;;  %v555_v20 = vadd.f32 %v527_v18, %v390_v55  ;;  %v3386_v21 = vpop.f32.mrf.mxu3 }
  0xcc   : > { %v820_v38 = vadd.f32 %v792_v0, %v555_v20 }
  0xce   : > { %v973_v22 = vadd.f32 %v945_v5, %v820_v38 }
  0xd0   : > { %v1126_v23 = vadd.f32 %v1098_v19, %v973_v22 }
  0xd1   : > { %v529_v25 = vpop.f32.mrf.mxu1  ;;  %v1100_v26 = vpop.f32.mrf.mxu0 }
  0xd2   : > { %v802_v24 = vpop.f32.mrf.mxu2  ;;  %v556_v27 = vadd.f32 %v529_v25, %v392_v2  ;;  %v955_v29 = vpop.f32.mrf.mxu3 }
  0xd4   : > { %v821_v28 = vadd.f32 %v794_v9, %v556_v27 }
  0xd9   : > { %v532_v31 = vpop.f32.mrf.mxu1  ;;  %v1103_v32 = vpop.f32.mrf.mxu0 }
  0xda   : > { %v804_v30 = vpop.f32.mrf.mxu2  ;;  %v557_v33 = vadd.f32 %v532_v31, %v395_v11  ;;  %v3388_v39 = vpop.f32.mrf.mxu3 }
  0xdc   : > { %v822_v34 = vadd.f32 %v797_v13, %v557_v33 }
  0xde   : > { %v975_v35 = vadd.f32 %v950_v16, %v822_v34 }
  0xe0   : > { %v1128_v36 = vadd.f32 %v1103_v32, %v975_v35 }
  0xe1   : > { %v534_v40 = vpop.f32.mrf.mxu1  ;;  %v3390_v41 = vpop.f32.mrf.mxu0 }
  0xe2   : > { %v807_v37 = vpop.f32.mrf.mxu2  ;;  %v558_v42 = vadd.f32 %v534_v40, %v397_v15  ;;  %v960_v48 = vpop.f32.mrf.mxu3  ;;  %v974_v15 = vadd.f32 %v3384_v12, %v821_v28  ;;  %v3416_v12 = vld [vmem:[%s3465_s3] ss:$0 sm:$0xff] }
  0xe4   : > { %v823_v43 = vadd.f32 %v799_v17, %v558_v42  ;;  %v1127_v17 = vadd.f32 %v1100_v26, %v974_v15 }
  0xe6   : > { %v976_v33 = vadd.f32 %v3386_v21, %v823_v43 }
  0xe9   : > { %v537_v45 = vpop.f32.mrf.mxu1  ;;  %v1108_v46 = vpop.f32.mrf.mxu0 }
  0xea   : > { %v809_v44 = vpop.f32.mrf.mxu2  ;;  %v559_v47 = vadd.f32 %v537_v45, %v400_v54  ;;  %v3398_v58 = vpop.f32.mrf.mxu3 }
  0xec   : > { %v824_v49 = vadd.f32 %v802_v24, %v559_v47 }
  0xee   : > { %v977_v50 = vadd.f32 %v955_v29, %v824_v49 }
  0xf0   : > { %v3392_v51 = vadd.f32 %v1108_v46, %v977_v50  ;;  %v1129_v46 = vadd.f32 %v3390_v41, %v976_v33 }
  0xf1   : > { %v539_v53 = vpop.f32.mrf.mxu1  ;;  %v3394_v55 = vpop.f32.mrf.mxu0 }
  0xf2   : > { %v1514_v52 = vpop.f32.mrf.mxu2  ;;  %v560_v56 = vadd.f32 %v539_v53, %v402_v1  ;;  %v1667_v0 = vpop.f32.mrf.mxu3 }
  0xf4   : > { %v3396_v57 = vadd.f32 %v804_v30, %v560_v56 }
  0xf9   : > { %v542_v60 = vpop.f32.mrf.mxu1  ;;  %v1113_v61 = vpop.f32.mrf.mxu0 }
  0xfa   : > { %v1516_v59 = vpop.f32.mrf.mxu2  ;;  %v561_v62 = vadd.f32 %v542_v60, %v405_v10  ;;  %v1669_v1 = vpop.f32.mrf.mxu3 }
  0xfc   : > { %v826_v63 = vadd.f32 %v807_v37, %v561_v62 }
  0xfe   : > { %v979_v54 = vadd.f32 %v960_v48, %v826_v63 }
 0x100   : > { %v3400_v2 = vadd.f32 %v1113_v61, %v979_v54  ;;  %v978_v54 = vadd.f32 %v3388_v39, %v3396_v57 }
 0x101   : > { %v544_v4 = vpop.f32.mrf.mxu1  ;;  %v3402_v5 = vpop.f32.mrf.mxu0 }
 0x102   : > { %v1519_v3 = vpop.f32.mrf.mxu2  ;;  %v562_v6 = vadd.f32 %v544_v4, %v407_v14  ;;  %v3410_v14 = vld [vmem:[%s3464_s2] ss:$0 sm:$0xff]  ;;  %v1672_v22 = vpop.f32.mrf.mxu3 }
 0x104   : > { %v3404_v7 = vadd.f32 %v809_v44, %v562_v6 }
 0x109   : > { %v1360_v8 = vpop.f32.mrf.mxu1  ;;  %v1929_v9 = vpop.f32.mrf.mxu0 }
 0x10a   : > { %v1388_v11 = vadd.f32 %v1360_v8, %v1126_v23  ;;  %v1521_v13 = vpop.f32.mrf.mxu2  ;;  %v1674_v37 = vpop.f32.mrf.mxu3  ;;  %v1131_v8 = vadd.f32 %v3394_v55, %v978_v54 }
 0x10c   : > { %v1542_v10 = vadd.f32 %v1514_v52, %v1388_v11 }
 0x10e   : > { %v1695_v16 = vadd.f32 %v1667_v0, %v1542_v10 }
 0x110   : > { %v1957_v20 = vadd.f32 %v1929_v9, %v1695_v16 }
 0x111   : > { %v1362_v18 = vpop.f32.mrf.mxu1  ;;  %v1931_v19 = vpop.f32.mrf.mxu0 }
 0x112   : > { %v1389_v38 = vadd.f32 %v1362_v18, %v1127_v17  ;;  %v1524_v25 = vpop.f32.mrf.mxu2  ;;  %v1985_v23 = vmul.f32 %v3410_v14, %v1957_v20  ;;  %v1677_v53 = vpop.f32.mrf.mxu3 }
 0x114   : > { %v1543_v24 = vadd.f32 %v1516_v59, %v1389_v38  ;;  %v1997_v30 = vadd.f32 %v3416_v12, %v1985_v23 }
 0x116   : > { %v1696_v26 = vadd.f32 %v1669_v1, %v1543_v24  ;;  %v2005_v40 = vmax.f32 %v1997_v30, 0.0  ;;  %v980_v24 = vadd.f32 %v3398_v58, %v3404_v7 }
 0x118   : > { %v1958_v27 = vadd.f32 %v1931_v19, %v1696_v26  ;;  %v1133_v30 = vadd.f32 %v3402_v5, %v980_v24 }
 0x119   : > { %v1365_v28 = vpop.f32.mrf.mxu1  ;;  %v1934_v29 = vpop.f32.mrf.mxu0 }
 0x11a   : > { %v1986_v31 = vmul.f32 %v3410_v14, %v1958_v27  ;;  %v1390_v32 = vadd.f32 %v1365_v28, %v1128_v36  ;;  %v1526_v45 = vpop.f32.mrf.mxu2  ;;  %v1679_v11 = vpop.f32.mrf.mxu3 }
 0x11c   : > { %v1998_v34 = vadd.f32 %v3416_v12, %v1986_v31  ;;  %v1544_v35 = vadd.f32 %v1519_v3, %v1390_v32 }
 0x11e   : > { %v2006_v42 = vmax.f32 %v1998_v34, 0.0  ;;  %v1697_v44 = vadd.f32 %v1672_v22, %v1544_v35 }
 0x120   : > { %v2882_v36 = vpack.c.bf16 %v2006_v42, %v2005_v40  ;;  %v1959_v43 = vadd.f32 %v1934_v29, %v1697_v44 }
 0x121   : > { %v1367_v47 = vpop.f32.mrf.mxu1  ;;  %v1936_v21 = vpop.f32.mrf.mxu0 }
 0x122   : > { %2883 = vst [vmem:[%s3426_s25] sm:$0xff] %v2882_v36   ;;  %v1391_v48 = vadd.f32 %v1367_v47, %v1129_v46  ;;  %v1987_v50 = vmul.f32 %v3410_v14, %v1959_v43  ;;  %v1529_v59 = vpop.f32.mrf.mxu2  ;;  %v1682_v22 = vpop.f32.mrf.mxu3 }
 0x124   : > { %v1545_v49 = vadd.f32 %v1521_v13, %v1391_v48  ;;  %v1999_v61 = vadd.f32 %v3416_v12, %v1987_v50 }
 0x126   : > { %v1698_v52 = vadd.f32 %v1674_v37, %v1545_v49  ;;  %v2007_v4 = vmax.f32 %v1999_v61, 0.0 }
 0x128   : > { %v1960_v56 = vadd.f32 %v1936_v21, %v1698_v52 }
 0x129   : > { %v1370_v60 = vpop.f32.mrf.mxu1  ;;  %v1939_v63 = vpop.f32.mrf.mxu0 }
 0x12a   : > { %v1988_v62 = vmul.f32 %v3410_v14, %v1960_v56  ;;  %v1392_v41 = vadd.f32 %v1370_v60, %v3392_v51  ;;  %v1531_v16 = vpop.f32.mrf.mxu2  ;;  %v1684_v35 = vpop.f32.mrf.mxu3 }
 0x12c   : > { %v2000_v0 = vadd.f32 %v3416_v12, %v1988_v62  ;;  %v1546_v3 = vadd.f32 %v1524_v25, %v1392_v41 }
 0x12e   : > { %v2008_v6 = vmax.f32 %v2000_v0, 0.0  ;;  %v1699_v1 = vadd.f32 %v1677_v53, %v1546_v3 }
 0x130   : > { %v2887_v9 = vpack.c.bf16 %v2008_v6, %v2007_v4  ;;  %v1961_v15 = vadd.f32 %v1939_v63, %v1699_v1 }
 0x131   : > { %v1372_v13 = vpop.f32.mrf.mxu1  ;;  %v1941_v17 = vpop.f32.mrf.mxu0 }
 0x132   : > { %2899 = vst [vmem:[%s3426_s25 + $0x8] sm:$0xff] %v2887_v9   ;;  %v1393_v10 = vadd.f32 %v1372_v13, %v1131_v8  ;;  %v1989_v18 = vmul.f32 %v3410_v14, %v1961_v15  ;;  %v1944_v26 = vpop.f32.mrf.mxu2 }
 0x134   : > { %v1547_v51 = vadd.f32 %v1526_v45, %v1393_v10  ;;  %v2001_v20 = vadd.f32 %v3416_v12, %v1989_v18 }
 0x136   : > { %v1700_v39 = vadd.f32 %v1679_v11, %v1547_v51  ;;  %v2009_v27 = vmax.f32 %v2001_v20, 0.0 }
 0x138   : > { %v1962_v57 = vadd.f32 %v1941_v17, %v1700_v39 }
 0x139   : > { %v1375_v19 = vpop.f32.mrf.mxu1 }
 0x13a   : > { %v1990_v38 = vmul.f32 %v3410_v14, %v1962_v57  ;;  %v1394_v55 = vadd.f32 %v1375_v19, %v3400_v2  ;;  %v1946_v7 = vpop.f32.mrf.mxu2 }
 0x13c   : > { %v2002_v25 = vadd.f32 %v3416_v12, %v1990_v38  ;;  %v1548_v23 = vadd.f32 %v1529_v59, %v1394_v55 }
 0x13e   : > { %v2010_v28 = vmax.f32 %v2002_v25, 0.0  ;;  %v1701_v29 = vadd.f32 %v1682_v22, %v1548_v23 }
 0x140   : > { %v2892_v31 = vpack.c.bf16 %v2010_v28, %v2009_v27  ;;  %v1963_v33 = vadd.f32 %v1944_v26, %v1701_v29 }
 0x141   : > { %v1377_v32 = vpop.f32.mrf.mxu1 }
 0x142   : > { %2900 = vst [vmem:[%s3426_s25 + $0x10] sm:$0xff] %v2892_v31   ;;  %v1395_v34 = vadd.f32 %v1377_v32, %v1133_v30  ;;  %v1991_v37 = vmul.f32 %v3410_v14, %v1963_v33 }
 0x144   : > { %v1549_v2 = vadd.f32 %v1531_v16, %v1395_v34  ;;  %v2003_v42 = vadd.f32 %v3416_v12, %v1991_v37 }
 0x146   : > { %v1702_v58 = vadd.f32 %v1684_v35, %v1549_v2  ;;  %v2011_v5 = vmax.f32 %v2003_v42, 0.0 }
 0x148   : > { %v1964_v40 = vadd.f32 %v1946_v7, %v1702_v58 }
 0x14a   : > { %v1992_v44 = vmul.f32 %v3410_v14, %v1964_v40 }
 0x14c   : > { %v2004_v45 = vadd.f32 %v3416_v12, %v1992_v44 }
 0x14e   : > { %v2012_v46 = vmax.f32 %v2004_v45, 0.0 }
 0x150   : > { %v2897_v36 = vpack.c.bf16 %v2012_v46, %v2011_v5 }
 0x152   : > { %2901 = vst [vmem:[%s3426_s25 + $0x18] sm:$0xff] %v2897_v36  }
 0x153 PF: > { %s14_s17 = sadd.s32 1, %s2967_s17   ;;  %s3469_s15 = smov %s2963_s16 }
 0x154   : > { %p11_p5 = scmp.ge.s32.totalorder %s14_s17, 4   ;;  %s3470_s16 = smov %s3472_s18 }
 0x156   :  { %13 = sbr.rel (!%p11_p5) target bundleno = 2 (0x2), region = 89 }

// kernel: resnet_block_forward.6
= control target key start
LH: loop header
LB: loop body
LE: loop exit
PB: predicated region body
PF: predicated region fallthrough
CT: control target
= control target key end

     0   :  { %s592_s1 = inlined_call_operand.vmem [shape: bf16[128,128], index: 1, kind: input, shape index: {}]   ;;  %s593_s2 = inlined_call_operand.vmem [shape: f32[1,128], index: 2, kind: input, shape index: {}]   ;;  %s594_s3 = inlined_call_operand.vmem [shape: f32[1,128], index: 3, kind: input, shape index: {}]   ;;  %s595_s0 = inlined_call_operand.vmem [shape: bf16[128,128], index: 0, kind: input, shape index: {}]   ;;  %s596_s4 = inlined_call_operand.vmem [shape: f32[128,128], index: 4, kind: output, shape index: {}]  }
   0x1   :  { %v420_v0 = vld [vmem:[%s592_s1 + $0x38] sm:$0xff]  ;;  %v419_v1 = vld [vmem:[%s592_s1 + $0x30] sm:$0xff]  ;;  %v418_v2 = vld [vmem:[%s592_s1 + $0x28] sm:$0xff] }
   0x2   :  { %181 = vmatpush.bf16.msra.mxu0 %v420_v0  ;;  %421 = vmatpush.bf16.msra.mxu1 %v420_v0  ;;  %v417_v3 = vld [vmem:[%s592_s1 + $0x20] sm:$0xff]  ;;  %v416_v4 = vld [vmem:[%s592_s1 + $0x18] sm:$0xff]  ;;  %v415_v5 = vld [vmem:[%s592_s1 + $0x10] sm:$0xff] }
   0x3   :  { %422 = vmatpush.bf16.msra.mxu2 %v420_v0  ;;  %423 = vmatpush.bf16.msra.mxu3 %v420_v0  ;;  %v414_v6 = vld [vmem:[%s592_s1 + $0x8] sm:$0xff]  ;;  %v413_v7 = vld [vmem:[%s592_s1] sm:$0xff]  ;;  %v407_v9 = vld [vmem:[%s595_s0 + $0x10] sm:$0xff] }
   0x4   :  { %v405_v8 = vld [vmem:[%s595_s0] sm:$0xff]  ;;  %v411_v11 = vld [vmem:[%s595_s0 + $0x30] sm:$0xff]  ;;  %v406_v12 = vld [vmem:[%s595_s0 + $0x8] sm:$0xff] }
   0x5   :  { %v409_v10 = vld [vmem:[%s595_s0 + $0x20] sm:$0xff]  ;;  %v408_v13 = vld [vmem:[%s595_s0 + $0x18] sm:$0xff]  ;;  %v410_v14 = vld [vmem:[%s595_s0 + $0x28] sm:$0xff] }
   0x6   :  { %182 = vmatpush.bf16.msra.mxu0 %v419_v1  ;;  %424 = vmatpush.bf16.msra.mxu1 %v419_v1  ;;  %v412_v15 = vld [vmem:[%s595_s0 + $0x38] sm:$0xff]  ;;  %v445_v16 = vld [vmem:[%s593_s2] ss:$0 sm:$0xff] }
   0x7   :  { %425 = vmatpush.bf16.msra.mxu2 %v419_v1  ;;  %426 = vmatpush.bf16.msra.mxu3 %v419_v1  ;;  %v526_v17 = vld [vmem:[%s594_s3] ss:$0 sm:$0xff] }
   0xa   :  { %183 = vmatpush.bf16.msra.mxu0 %v418_v2  ;;  %427 = vmatpush.bf16.msra.mxu1 %v418_v2 }
   0xb   :  { %428 = vmatpush.bf16.msra.mxu2 %v418_v2  ;;  %429 = vmatpush.bf16.msra.mxu3 %v418_v2 }
   0xe   :  { %184 = vmatpush.bf16.msra.mxu0 %v417_v3  ;;  %430 = vmatpush.bf16.msra.mxu1 %v417_v3 }
   0xf   :  { %431 = vmatpush.bf16.msra.mxu2 %v417_v3  ;;  %432 = vmatpush.bf16.msra.mxu3 %v417_v3 }
  0x12   :  { %185 = vmatpush.bf16.msra.mxu0 %v416_v4  ;;  %433 = vmatpush.bf16.msra.mxu1 %v416_v4 }
  0x13   :  { %434 = vmatpush.bf16.msra.mxu2 %v416_v4  ;;  %435 = vmatpush.bf16.msra.mxu3 %v416_v4 }
  0x16   :  { %186 = vmatpush.bf16.msra.mxu0 %v415_v5  ;;  %436 = vmatpush.bf16.msra.mxu1 %v415_v5 }
  0x17   :  { %437 = vmatpush.bf16.msra.mxu2 %v415_v5  ;;  %438 = vmatpush.bf16.msra.mxu3 %v415_v5 }
  0x1a   :  { %187 = vmatpush.bf16.msra.mxu0 %v414_v6  ;;  %439 = vmatpush.bf16.msra.mxu1 %v414_v6 }
  0x1b   :  { %440 = vmatpush.bf16.msra.mxu2 %v414_v6  ;;  %441 = vmatpush.bf16.msra.mxu3 %v414_v6 }
  0x1e   :  { %188 = vmatpush.bf16.msra.mxu0 %v413_v7  ;;  %442 = vmatpush.bf16.msra.mxu1 %v413_v7 }
  0x1f   :  { %443 = vmatpush.bf16.msra.mxu2 %v413_v7  ;;  %444 = vmatpush.bf16.msra.mxu3 %v413_v7 }
  0x21   :  { %189 = vmatmul.bf16.vlgmr.msra.gmra.mxu0 %v405_v8  ;;  %199 = vmatmul.bf16.vlgmr.msra.gmra.mxu1 %v407_v9 }
  0x22   :  { %209 = vmatmul.bf16.vlgmr.msra.gmra.mxu2 %v409_v10  ;;  %219 = vmatmul.bf16.vlgmr.msra.gmra.mxu3 %v411_v11 }
  0x31   :  { %194 = vmatmul.bf16.gmra.mxu0 %v406_v12  ;;  %204 = vmatmul.bf16.gmra.mxu1 %v408_v13 }
  0x32   :  { %214 = vmatmul.bf16.gmra.mxu2 %v410_v14  ;;  %224 = vmatmul.bf16.gmra.mxu3 %v412_v15 }
  0x9e   :  { %v190_v18 = vpop.f32.mrf.mxu0  ;;  %v200_v19 = vpop.f32.mrf.mxu1 }
  0x9f   :  { %v285_v20 = vmul.f32 %v445_v16, %v190_v18  ;;  %v289_v21 = vmul.f32 %v445_v16, %v200_v19 }
  0xa1   :  { %v305_v22 = vadd.f32 %v526_v17, %v285_v20  ;;  %v309_v23 = vadd.f32 %v526_v17, %v289_v21 }
  0xa3   :  { %321 = vst [vmem:[%s596_s4] sm:$0xff] %v305_v22 }
  0xa4   :  { %325 = vst [vmem:[%s596_s4 + $0x20] sm:$0xff] %v309_v23 }
  0xa5   :  { %v210_v24 = vpop.f32.mrf.mxu2  ;;  %v220_v25 = vpop.f32.mrf.mxu3 }
  0xa6   :  { %v293_v26 = vmul.f32 %v445_v16, %v210_v24  ;;  %v297_v27 = vmul.f32 %v445_v16, %v220_v25  ;;  %v192_v28 = vpop.f32.mrf.mxu0  ;;  %v202_v29 = vpop.f32.mrf.mxu1 }
  0xa7   :  { %v286_v30 = vmul.f32 %v445_v16, %v192_v28  ;;  %v290_v31 = vmul.f32 %v445_v16, %v202_v29 }
  0xa8   :  { %v313_v32 = vadd.f32 %v526_v17, %v293_v26  ;;  %v317_v33 = vadd.f32 %v526_v17, %v297_v27 }
  0xa9   :  { %v306_v34 = vadd.f32 %v526_v17, %v286_v30  ;;  %v310_v35 = vadd.f32 %v526_v17, %v290_v31 }
  0xaa   :  { %329 = vst [vmem:[%s596_s4 + $0x40] sm:$0xff] %v313_v32 }
  0xab   :  { %333 = vst [vmem:[%s596_s4 + $0x60] sm:$0xff] %v317_v33 }
  0xac   :  { %322 = vst [vmem:[%s596_s4 + $0x8] sm:$0xff] %v306_v34 }
  0xad   :  { %326 = vst [vmem:[%s596_s4 + $0x28] sm:$0xff] %v310_v35  ;;  %v212_v36 = vpop.f32.mrf.mxu2  ;;  %v222_v37 = vpop.f32.mrf.mxu3 }
  0xae   :  { %v294_v38 = vmul.f32 %v445_v16, %v212_v36  ;;  %v298_v39 = vmul.f32 %v445_v16, %v222_v37  ;;  %v195_v40 = vpop.f32.mrf.mxu0  ;;  %v205_v41 = vpop.f32.mrf.mxu1 }
  0xaf   :  { %v287_v42 = vmul.f32 %v445_v16, %v195_v40  ;;  %v291_v43 = vmul.f32 %v445_v16, %v205_v41 }
  0xb0   :  { %v314_v44 = vadd.f32 %v526_v17, %v294_v38  ;;  %v318_v45 = vadd.f32 %v526_v17, %v298_v39 }
  0xb1   :  { %v307_v46 = vadd.f32 %v526_v17, %v287_v42  ;;  %v311_v47 = vadd.f32 %v526_v17, %v291_v43 }
  0xb2   :  { %330 = vst [vmem:[%s596_s4 + $0x48] sm:$0xff] %v314_v44 }
  0xb3   :  { %334 = vst [vmem:[%s596_s4 + $0x68] sm:$0xff] %v318_v45 }
  0xb4   :  { %323 = vst [vmem:[%s596_s4 + $0x10] sm:$0xff] %v307_v46 }
  0xb5   :  { %327 = vst [vmem:[%s596_s4 + $0x30] sm:$0xff] %v311_v47  ;;  %v215_v48 = vpop.f32.mrf.mxu2  ;;  %v225_v49 = vpop.f32.mrf.mxu3 }
  0xb6   :  { %v295_v50 = vmul.f32 %v445_v16, %v215_v48  ;;  %v299_v51 = vmul.f32 %v445_v16, %v225_v49  ;;  %v197_v52 = vpop.f32.mrf.mxu0  ;;  %v207_v53 = vpop.f32.mrf.mxu1 }
  0xb7   :  { %v288_v54 = vmul.f32 %v445_v16, %v197_v52  ;;  %v292_v55 = vmul.f32 %v445_v16, %v207_v53 }
  0xb8   :  { %v315_v56 = vadd.f32 %v526_v17, %v295_v50  ;;  %v319_v57 = vadd.f32 %v526_v17, %v299_v51 }
  0xb9   :  { %v308_v58 = vadd.f32 %v526_v17, %v288_v54  ;;  %v312_v59 = vadd.f32 %v526_v17, %v292_v55 }
  0xba   :  { %331 = vst [vmem:[%s596_s4 + $0x50] sm:$0xff] %v315_v56 }
  0xbb   :  { %335 = vst [vmem:[%s596_s4 + $0x70] sm:$0xff] %v319_v57 }
  0xbc   :  { %324 = vst [vmem:[%s596_s4 + $0x18] sm:$0xff] %v308_v58 }
  0xbd   :  { %328 = vst [vmem:[%s596_s4 + $0x38] sm:$0xff] %v312_v59  ;;  %v217_v60 = vpop.f32.mrf.mxu2  ;;  %v227_v61 = vpop.f32.mrf.mxu3 }
  0xbe   :  { %v296_v62 = vmul.f32 %v445_v16, %v217_v60  ;;  %v300_v63 = vmul.f32 %v445_v16, %v227_v61 }
  0xc0   :  { %v316_v0 = vadd.f32 %v526_v17, %v296_v62  ;;  %v320_v1 = vadd.f32 %v526_v17, %v300_v63 }
  0xc2   :  { %332 = vst [vmem:[%s596_s4 + $0x58] sm:$0xff] %v316_v0 }
  0xc3   :  { %336 = vst [vmem:[%s596_s4 + $0x78] sm:$0xff] %v320_v1 }

// kernel: resnet_block_forward.7
= control target key start
LH: loop header
LB: loop body
LE: loop exit
PB: predicated region body
PF: predicated region fallthrough
CT: control target
= control target key end

     0   :  { %s714_s1 = inlined_call_operand.vmem [shape: bf16[128,128], index: 1, kind: input, shape index: {}]   ;;  %s715_s2 = inlined_call_operand.vmem [shape: f32[1,128], index: 2, kind: input, shape index: {}]   ;;  %s716_s3 = inlined_call_operand.vmem [shape: f32[1,128], index: 3, kind: input, shape index: {}]   ;;  %s717_s0 = inlined_call_operand.vmem [shape: bf16[128,128], index: 0, kind: input, shape index: {}]   ;;  %s718_s4 = inlined_call_operand.vmem [shape: f32[128,128], index: 4, kind: input, shape index: {}]   ;;  %s719_s5 = inlined_call_operand.vmem [shape: f32[128,128], index: 5, kind: output, shape index: {}]  }
   0x1   :  { %v471_v0 = vld [vmem:[%s714_s1 + $0x38] sm:$0xff]  ;;  %v470_v1 = vld [vmem:[%s714_s1 + $0x30] sm:$0xff]  ;;  %v469_v2 = vld [vmem:[%s714_s1 + $0x28] sm:$0xff] }
   0x2   :  { %184 = vmatpush.bf16.msra.mxu0 %v471_v0  ;;  %472 = vmatpush.bf16.msra.mxu1 %v471_v0  ;;  %v468_v3 = vld [vmem:[%s714_s1 + $0x20] sm:$0xff]  ;;  %v467_v4 = vld [vmem:[%s714_s1 + $0x18] sm:$0xff]  ;;  %v466_v5 = vld [vmem:[%s714_s1 + $0x10] sm:$0xff] }
   0x3   :  { %473 = vmatpush.bf16.msra.mxu2 %v471_v0  ;;  %474 = vmatpush.bf16.msra.mxu3 %v471_v0  ;;  %v465_v6 = vld [vmem:[%s714_s1 + $0x8] sm:$0xff]  ;;  %v464_v7 = vld [vmem:[%s714_s1] sm:$0xff]  ;;  %v458_v9 = vld [vmem:[%s717_s0 + $0x10] sm:$0xff] }
   0x4   :  { %v456_v8 = vld [vmem:[%s717_s0] sm:$0xff]  ;;  %v462_v11 = vld [vmem:[%s717_s0 + $0x30] sm:$0xff]  ;;  %v457_v12 = vld [vmem:[%s717_s0 + $0x8] sm:$0xff] }
   0x5   :  { %v460_v10 = vld [vmem:[%s717_s0 + $0x20] sm:$0xff]  ;;  %v459_v13 = vld [vmem:[%s717_s0 + $0x18] sm:$0xff]  ;;  %v461_v14 = vld [vmem:[%s717_s0 + $0x28] sm:$0xff] }
   0x6   :  { %185 = vmatpush.bf16.msra.mxu0 %v470_v1  ;;  %475 = vmatpush.bf16.msra.mxu1 %v470_v1  ;;  %v463_v15 = vld [vmem:[%s717_s0 + $0x38] sm:$0xff]  ;;  %v579_v16 = vld [vmem:[%s715_s2] ss:$0 sm:$0xff]  ;;  %v325_v42 = vld [vmem:[%s718_s4 + $0x8] sm:$0xff] }
   0x7   :  { %476 = vmatpush.bf16.msra.mxu2 %v470_v1  ;;  %477 = vmatpush.bf16.msra.mxu3 %v470_v1  ;;  %v584_v17 = vld [vmem:[%s716_s3] ss:$0 sm:$0xff]  ;;  %v329_v43 = vld [vmem:[%s718_s4 + $0x28] sm:$0xff] }
   0x8   :  { %v324_v22 = vld [vmem:[%s718_s4] sm:$0xff]  ;;  %v333_v60 = vld [vmem:[%s718_s4 + $0x48] sm:$0xff] }
   0x9   :  { %v328_v23 = vld [vmem:[%s718_s4 + $0x20] sm:$0xff]  ;;  %v337_v61 = vld [vmem:[%s718_s4 + $0x68] sm:$0xff] }
   0xa   :  { %186 = vmatpush.bf16.msra.mxu0 %v469_v2  ;;  %478 = vmatpush.bf16.msra.mxu1 %v469_v2  ;;  %v332_v36 = vld [vmem:[%s718_s4 + $0x40] sm:$0xff] }
   0xb   :  { %479 = vmatpush.bf16.msra.mxu2 %v469_v2  ;;  %480 = vmatpush.bf16.msra.mxu3 %v469_v2  ;;  %v336_v37 = vld [vmem:[%s718_s4 + $0x60] sm:$0xff]  ;;  %v326_v2 = vld [vmem:[%s718_s4 + $0x10] sm:$0xff] }
   0xe   :  { %187 = vmatpush.bf16.msra.mxu0 %v468_v3  ;;  %481 = vmatpush.bf16.msra.mxu1 %v468_v3 }
   0xf   :  { %482 = vmatpush.bf16.msra.mxu2 %v468_v3  ;;  %483 = vmatpush.bf16.msra.mxu3 %v468_v3  ;;  %v330_v3 = vld [vmem:[%s718_s4 + $0x30] sm:$0xff] }
  0x12   :  { %188 = vmatpush.bf16.msra.mxu0 %v467_v4  ;;  %484 = vmatpush.bf16.msra.mxu1 %v467_v4 }
  0x13   :  { %485 = vmatpush.bf16.msra.mxu2 %v467_v4  ;;  %486 = vmatpush.bf16.msra.mxu3 %v467_v4 }
  0x16   :  { %189 = vmatpush.bf16.msra.mxu0 %v466_v5  ;;  %487 = vmatpush.bf16.msra.mxu1 %v466_v5 }
  0x17   :  { %488 = vmatpush.bf16.msra.mxu2 %v466_v5  ;;  %489 = vmatpush.bf16.msra.mxu3 %v466_v5 }
  0x1a   :  { %190 = vmatpush.bf16.msra.mxu0 %v465_v6  ;;  %490 = vmatpush.bf16.msra.mxu1 %v465_v6 }
  0x1b   :  { %491 = vmatpush.bf16.msra.mxu2 %v465_v6  ;;  %492 = vmatpush.bf16.msra.mxu3 %v465_v6 }
  0x1e   :  { %191 = vmatpush.bf16.msra.mxu0 %v464_v7  ;;  %493 = vmatpush.bf16.msra.mxu1 %v464_v7 }
  0x1f   :  { %494 = vmatpush.bf16.msra.mxu2 %v464_v7  ;;  %495 = vmatpush.bf16.msra.mxu3 %v464_v7 }
  0x21   :  { %192 = vmatmul.bf16.vlgmr.msra.gmra.mxu0 %v456_v8  ;;  %202 = vmatmul.bf16.vlgmr.msra.gmra.mxu1 %v458_v9 }
  0x22   :  { %212 = vmatmul.bf16.vlgmr.msra.gmra.mxu2 %v460_v10  ;;  %222 = vmatmul.bf16.vlgmr.msra.gmra.mxu3 %v462_v11 }
  0x31   :  { %197 = vmatmul.bf16.gmra.mxu0 %v457_v12  ;;  %207 = vmatmul.bf16.gmra.mxu1 %v459_v13 }
  0x32   :  { %217 = vmatmul.bf16.gmra.mxu2 %v461_v14  ;;  %227 = vmatmul.bf16.gmra.mxu3 %v463_v15 }
  0x9e   :  { %v193_v18 = vpop.f32.mrf.mxu0  ;;  %v203_v19 = vpop.f32.mrf.mxu1 }
  0x9f   :  { %v288_v20 = vmul.f32 %v579_v16, %v193_v18  ;;  %v292_v21 = vmul.f32 %v579_v16, %v203_v19 }
  0xa1   :  { %v308_v24 = vadd.f32 %v584_v17, %v288_v20  ;;  %v312_v25 = vadd.f32 %v584_v17, %v292_v21 }
  0xa3   :  { %v340_v26 = vadd.f32 %v324_v22, %v308_v24  ;;  %v344_v27 = vadd.f32 %v328_v23, %v312_v25  ;;  %v334_v22 = vld [vmem:[%s718_s4 + $0x50] sm:$0xff] }
  0xa4   :  { %v338_v23 = vld [vmem:[%s718_s4 + $0x70] sm:$0xff] }
  0xa5   :  { %v356_v28 = vmax.f32 %v340_v26, 0.0  ;;  %v360_v29 = vmax.f32 %v344_v27, 0.0  ;;  %v213_v30 = vpop.f32.mrf.mxu2  ;;  %v223_v31 = vpop.f32.mrf.mxu3 }
  0xa6   :  { %v296_v32 = vmul.f32 %v579_v16, %v213_v30  ;;  %v300_v33 = vmul.f32 %v579_v16, %v223_v31  ;;  %v195_v34 = vpop.f32.mrf.mxu0  ;;  %v205_v35 = vpop.f32.mrf.mxu1 }
  0xa7   :  { %372 = vst [vmem:[%s719_s5] sm:$0xff] %v356_v28  ;;  %v289_v38 = vmul.f32 %v579_v16, %v195_v34  ;;  %v293_v39 = vmul.f32 %v579_v16, %v205_v35  ;;  %v327_v28 = vld [vmem:[%s718_s4 + $0x18] sm:$0xff] }
  0xa8   :  { %376 = vst [vmem:[%s719_s5 + $0x20] sm:$0xff] %v360_v29  ;;  %v316_v40 = vadd.f32 %v584_v17, %v296_v32  ;;  %v320_v41 = vadd.f32 %v584_v17, %v300_v33  ;;  %v331_v29 = vld [vmem:[%s718_s4 + $0x38] sm:$0xff] }
  0xa9   :  { %v309_v44 = vadd.f32 %v584_v17, %v289_v38  ;;  %v313_v45 = vadd.f32 %v584_v17, %v293_v39 }
  0xaa   :  { %v348_v46 = vadd.f32 %v332_v36, %v316_v40  ;;  %v352_v47 = vadd.f32 %v336_v37, %v320_v41 }
  0xab   :  { %v341_v48 = vadd.f32 %v325_v42, %v309_v44  ;;  %v345_v49 = vadd.f32 %v329_v43, %v313_v45  ;;  %v335_v44 = vld [vmem:[%s718_s4 + $0x58] sm:$0xff] }
  0xac   :  { %v364_v50 = vmax.f32 %v348_v46, 0.0  ;;  %v368_v51 = vmax.f32 %v352_v47, 0.0  ;;  %v339_v45 = vld [vmem:[%s718_s4 + $0x78] sm:$0xff] }
  0xad   :  { %v357_v52 = vmax.f32 %v341_v48, 0.0  ;;  %v361_v53 = vmax.f32 %v345_v49, 0.0  ;;  %v215_v54 = vpop.f32.mrf.mxu2  ;;  %v225_v55 = vpop.f32.mrf.mxu3 }
  0xae   :  { %380 = vst [vmem:[%s719_s5 + $0x40] sm:$0xff] %v364_v50  ;;  %v297_v56 = vmul.f32 %v579_v16, %v215_v54  ;;  %v301_v57 = vmul.f32 %v579_v16, %v225_v55  ;;  %v198_v58 = vpop.f32.mrf.mxu0  ;;  %v208_v59 = vpop.f32.mrf.mxu1 }
  0xaf   :  { %384 = vst [vmem:[%s719_s5 + $0x60] sm:$0xff] %v368_v51  ;;  %v290_v62 = vmul.f32 %v579_v16, %v198_v58  ;;  %v294_v63 = vmul.f32 %v579_v16, %v208_v59 }
  0xb0   :  { %373 = vst [vmem:[%s719_s5 + $0x8] sm:$0xff] %v357_v52  ;;  %v317_v0 = vadd.f32 %v584_v17, %v297_v56  ;;  %v321_v1 = vadd.f32 %v584_v17, %v301_v57 }
  0xb1   :  { %377 = vst [vmem:[%s719_s5 + $0x28] sm:$0xff] %v361_v53  ;;  %v310_v4 = vadd.f32 %v584_v17, %v290_v62  ;;  %v314_v5 = vadd.f32 %v584_v17, %v294_v63 }
  0xb2   :  { %v349_v6 = vadd.f32 %v333_v60, %v317_v0  ;;  %v353_v7 = vadd.f32 %v337_v61, %v321_v1 }
  0xb3   :  { %v342_v8 = vadd.f32 %v326_v2, %v310_v4  ;;  %v346_v9 = vadd.f32 %v330_v3, %v314_v5 }
  0xb4   :  { %v365_v10 = vmax.f32 %v349_v6, 0.0  ;;  %v369_v11 = vmax.f32 %v353_v7, 0.0 }
  0xb5   :  { %v358_v12 = vmax.f32 %v342_v8, 0.0  ;;  %v362_v13 = vmax.f32 %v346_v9, 0.0  ;;  %v218_v14 = vpop.f32.mrf.mxu2  ;;  %v228_v15 = vpop.f32.mrf.mxu3 }
  0xb6   :  { %381 = vst [vmem:[%s719_s5 + $0x48] sm:$0xff] %v365_v10  ;;  %v298_v18 = vmul.f32 %v579_v16, %v218_v14  ;;  %v302_v19 = vmul.f32 %v579_v16, %v228_v15  ;;  %v200_v20 = vpop.f32.mrf.mxu0  ;;  %v210_v21 = vpop.f32.mrf.mxu1 }
  0xb7   :  { %385 = vst [vmem:[%s719_s5 + $0x68] sm:$0xff] %v369_v11  ;;  %v291_v24 = vmul.f32 %v579_v16, %v200_v20  ;;  %v295_v25 = vmul.f32 %v579_v16, %v210_v21 }
  0xb8   :  { %374 = vst [vmem:[%s719_s5 + $0x10] sm:$0xff] %v358_v12  ;;  %v318_v26 = vadd.f32 %v584_v17, %v298_v18  ;;  %v322_v27 = vadd.f32 %v584_v17, %v302_v19 }
  0xb9   :  { %378 = vst [vmem:[%s719_s5 + $0x30] sm:$0xff] %v362_v13  ;;  %v311_v30 = vadd.f32 %v584_v17, %v291_v24  ;;  %v315_v31 = vadd.f32 %v584_v17, %v295_v25 }
  0xba   :  { %v350_v32 = vadd.f32 %v334_v22, %v318_v26  ;;  %v354_v33 = vadd.f32 %v338_v23, %v322_v27 }
  0xbb   :  { %v343_v34 = vadd.f32 %v327_v28, %v311_v30  ;;  %v347_v35 = vadd.f32 %v331_v29, %v315_v31 }
  0xbc   :  { %v366_v36 = vmax.f32 %v350_v32, 0.0  ;;  %v370_v37 = vmax.f32 %v354_v33, 0.0 }
  0xbd   :  { %v359_v38 = vmax.f32 %v343_v34, 0.0  ;;  %v363_v39 = vmax.f32 %v347_v35, 0.0  ;;  %v220_v40 = vpop.f32.mrf.mxu2  ;;  %v230_v41 = vpop.f32.mrf.mxu3 }
  0xbe   :  { %382 = vst [vmem:[%s719_s5 + $0x50] sm:$0xff] %v366_v36  ;;  %v299_v42 = vmul.f32 %v579_v16, %v220_v40  ;;  %v303_v43 = vmul.f32 %v579_v16, %v230_v41 }
  0xbf   :  { %386 = vst [vmem:[%s719_s5 + $0x70] sm:$0xff] %v370_v37 }
  0xc0   :  { %375 = vst [vmem:[%s719_s5 + $0x18] sm:$0xff] %v359_v38  ;;  %v319_v46 = vadd.f32 %v584_v17, %v299_v42  ;;  %v323_v16 = vadd.f32 %v584_v17, %v303_v43 }
  0xc1   :  { %379 = vst [vmem:[%s719_s5 + $0x38] sm:$0xff] %v363_v39 }
  0xc2   :  { %v351_v47 = vadd.f32 %v335_v44, %v319_v46  ;;  %v355_v48 = vadd.f32 %v339_v45, %v323_v16 }
  0xc4   :  { %v367_v49 = vmax.f32 %v351_v47, 0.0  ;;  %v371_v50 = vmax.f32 %v355_v48, 0.0 }
  0xc6   :  { %383 = vst [vmem:[%s719_s5 + $0x58] sm:$0xff] %v367_v49 }
  0xc7   :  { %387 = vst [vmem:[%s719_s5 + $0x78] sm:$0xff] %v371_v50 }

</bundles_post_ra>
